<compile_context>
chip_gen: v7x
topology: tpu7x:2x2x1
jax: 0.10.0
libtpu: 0.0.40
codegen_flags: <defaults>
</compile_context>

<pallas_src>
import functools

import numpy as np
import jax
import jax.numpy as jnp
from jax import lax
from jax.experimental import pallas as pl
from jax.experimental.pallas import tpu as pltpu

LANES = 128


# ---------------------------------------------------------------------------
# Fused forward kernel: conv1 -> conv2 -> maxpool -> fc1 -> fc2, one image per
# grid step, everything VMEM-resident.
# ---------------------------------------------------------------------------
def _fused_forward_kernel(x_ref, w1_ref, b1_ref, w2_ref, b2_ref,
                          fw1_ref, fb1_ref, fw2_ref, fb2_ref,
                          o_ref, xp2_ref, *, H, W, C1, C2, Ho):
    f32 = jnp.float32
    WC1 = W * C1
    WC2 = W * C2

    # ---- conv1: input ref is already row-padded (H+2) and lane-padded; the
    #      banded weights have matching zero rows, so 3 full matmuls suffice ----
    acc = jnp.zeros((H, WC1), f32)
    for kh in range(3):                                          # 3 dots, not 144
        acc += jnp.dot(x_ref[pl.ds(kh, H), :], w1_ref[kh],
                       preferred_element_type=f32)
    a1 = jnp.maximum(acc + b1_ref[...], 0.0)                     # (H, W*C1) lane-dense

    # ---- conv2: row zero-padding via VMEM scratch ----
    xp2_ref[pl.ds(0, 1), :] = jnp.zeros((1, WC1), f32)           # top pad row
    xp2_ref[pl.ds(H + 1, 1), :] = jnp.zeros((1, WC1), f32)       # bottom pad row
    xp2_ref[pl.ds(1, H), :] = a1                                 # interior

    acc = jnp.zeros((H, WC2), f32)
    for kh in range(3):
        acc += jnp.dot(xp2_ref[pl.ds(kh, H), :], w2_ref[kh],
                       preferred_element_type=f32)
    a2 = jnp.maximum(acc + b2_ref[...], 0.0)                     # (H, W*C2)

    # ---- fused 2x2 max-pool (pure VPU, stays in vregs) ----
    rmax = jnp.maximum(a2[0:H - 1, :], a2[1:H, :])               # even rows valid
    cmax = jnp.maximum(rmax[:, 0:(W - 1) * C2], rmax[:, C2:W * C2])
    # cmax[2*ho, 2*C2*wo + c] == maxpool2x2(a2)[ho, wo, c]; every other entry is
    # a don't-care that lands on a zero row of the fc1 weight slabs below.

    # ---- fc1 (+ReLU): one small matmul per pooled row; torch's (C,H,W)
    #      flatten order is folded into the pre-scattered weight slabs ----
    hidden = fb1_ref[...]                                        # (1, nh_pad=128)
    for ho in range(Ho):
        feat = cmax[2 * ho:2 * ho + 1, :]                        # (1, (W-1)*C2)
        hidden = hidden + jnp.dot(feat, fw1_ref[ho],
                                  preferred_element_type=f32)
    hidden = jnp.maximum(hidden, 0.0)

    # ---- fc2, zero-padded to a full 128-lane output ----
    out = jnp.dot(hidden, fw2_ref[...], preferred_element_type=f32) + fb2_ref[...]
    o_ref[...] = out                                             # (1, 128) unmasked store


# ---------------------------------------------------------------------------
# Host-side weight repacking (done once, outside the hot path).
# ---------------------------------------------------------------------------
def _banded_conv_weight(w_hwio, width, k_pad=None):
    """Fold a 3x3 pad=1 conv's kw taps + width zero-padding into per-kh band
    matrices of shape (KH, k_pad or width*Cin, width*Cout)."""
    KH, KW, Cin, Cout = w_hwio.shape
    w_np = np.asarray(w_hwio, np.float32)
    kdim = width * Cin if k_pad is None else k_pad
    band = np.zeros((KH, kdim, width * Cout), np.float32)
    for kh in range(KH):
        for w in range(width):
            for kw in range(KW):
                wc = w + kw - 1                                  # source column
                if 0 <= wc < width:
                    band[kh, wc * Cin:(wc + 1) * Cin,
                         w * Cout:(w + 1) * Cout] = w_np[kh, kw]
    return band


def pack_operands(params, H, W, out_classes):
    """Repack torch-layout params into the fused kernel's operand layout."""
    (w1, b1), (w2, b2) = params["conv"]
    (fw1, fb1), (fw2, fb2) = params["fc"]
    C0, C1 = w1.shape[2], w1.shape[3]
    C2 = w2.shape[3]
    Ho, Wo = H // 2, W // 2
    nh = fw1.shape[1]
    c0wp = -(-(W * C0) // LANES) * LANES                      # lane-pad conv1 K dim
    nh_pad = -(-nh // LANES) * LANES                           # lane-pad hidden dim

    w1b = _banded_conv_weight(w1, W, k_pad=c0wp)               # (3, c0wp, W*C1)
    w2b = _banded_conv_weight(w2, W)                           # (3, W*C1, W*C2)
    b1r = np.tile(np.asarray(b1, np.float32), W)[None, :]      # (1, W*C1)
    b2r = np.tile(np.asarray(b2, np.float32), W)[None, :]      # (1, W*C2)

    # fc1: scatter rows (torch CHW flatten index c*Ho*Wo + ho*Wo + wo) into the
    # in-kernel pooled-feature lane layout (slab ho, valid lane 2*C2*wo + c);
    # hidden dim zero-padded to nh_pad lanes.
    fw1_hwc = np.asarray(fw1, np.float32).reshape(C2, Ho, Wo, nh).transpose(1, 2, 0, 3)
    slab = np.zeros((Ho, Wo, 2 * C2, nh_pad), np.float32)
    slab[:, :, :C2, :nh] = fw1_hwc
    fw1b = slab.reshape(Ho, Wo * 2 * C2, nh_pad)[:, :(W - 1) * C2, :]
    fb1r = np.zeros((1, nh_pad), np.float32)
    fb1r[0, :nh] = np.asarray(fb1, np.float32)

    fw2p = np.zeros((nh_pad, LANES), np.float32)
    fw2p[:nh, :out_classes] = np.asarray(fw2, np.float32)
    fb2p = np.zeros((1, LANES), np.float32)
    fb2p[0, :out_classes] = np.asarray(fb2, np.float32)

    return tuple(jnp.asarray(a) for a in
                 (w1b, b1r, w2b, b2r, fw1b, fb1r, fw2p, fb2p))


# ---------------------------------------------------------------------------
# Fused forward wrapper.
# ---------------------------------------------------------------------------
def fused_forward(packed, x_nchw, *, out_classes):
    B, C0, H, W = x_nchw.shape
    w1b, b1r, w2b, b2r, fw1b, fb1r, fw2p, fb2p = packed
    C1 = b1r.shape[1] // W
    C2 = b2r.shape[1] // W
    Ho = fw1b.shape[0]
    c0wp = w1b.shape[1]

    # NCHW -> lane-dense (B, H, W*C0) once, then zero-pad rows (conv pad=1) and
    # lanes (to a 128 multiple) on the tiny input only (layout plumbing).
    x3d = jnp.transpose(x_nchw, (0, 2, 3, 1)).reshape(B, H, W * C0)
    xpad = jnp.pad(x3d, ((0, 0), (1, 1), (0, c0wp - W * C0)))

    kernel = functools.partial(_fused_forward_kernel, H=H, W=W,
                               C1=C1, C2=C2, Ho=Ho)
    out = pl.pallas_call(
        kernel,
        out_shape=jax.ShapeDtypeStruct((B, 1, LANES), jnp.float32),
        grid=(B,),
        in_specs=[
            pl.BlockSpec((None, H + 2, c0wp), lambda b: (b, 0, 0)),
            pl.BlockSpec(w1b.shape, lambda b: (0, 0, 0)),
            pl.BlockSpec(b1r.shape, lambda b: (0, 0)),
            pl.BlockSpec(w2b.shape, lambda b: (0, 0, 0)),
            pl.BlockSpec(b2r.shape, lambda b: (0, 0)),
            pl.BlockSpec(fw1b.shape, lambda b: (0, 0, 0)),
            pl.BlockSpec(fb1r.shape, lambda b: (0, 0)),
            pl.BlockSpec(fw2p.shape, lambda b: (0, 0)),
            pl.BlockSpec(fb2p.shape, lambda b: (0, 0)),
        ],
        out_specs=pl.BlockSpec((None, 1, LANES), lambda b: (b, 0, 0)),
        scratch_shapes=[
            pltpu.VMEM((H + 2, W * C1), jnp.float32),   # row-padded conv2 input
        ],
        compiler_params=pltpu.CompilerParams(dimension_semantics=("parallel",)),
    )(xpad, w1b, b1r, w2b, b2r, fw1b, fb1r, fw2p, fb2p)
    return out.reshape(B, LANES)[:, :out_classes]


# ---------------------------------------------------------------------------
# Parameter init (deterministic, synthetic, torch-style layout) + reference.
# ---------------------------------------------------------------------------
def init_params(key, in_size, out_classes, filters, pool_every, hidden_dims):
    in_c, in_h, in_w = in_size
    params = {"conv": [], "fc": []}
    c, h, w = in_c, in_h, in_w
    for i, cout in enumerate(filters):
        key, k1, k2 = jax.random.split(key, 3)
        fan_in = 9.0 * c
        wgt = jax.random.normal(k1, (3, 3, c, cout), jnp.float32) / (fan_in ** 0.5)
        bias = jax.random.uniform(k2, (cout,), jnp.float32, -1.0, 1.0) / (fan_in ** 0.5)
        params["conv"].append((wgt, bias))
        c = cout
        if (i + 1) % pool_every == 0:
            h //= 2
            w //= 2
    feat = c * h * w                                   # == extracted_features
    dims = [feat] + list(hidden_dims) + [out_classes]
    for fin, fout in zip(dims[:-1], dims[1:]):
        key, k1, k2 = jax.random.split(key, 3)
        wgt = jax.random.normal(k1, (fin, fout), jnp.float32) / (float(fin) ** 0.5)
        bias = jax.random.uniform(k2, (fout,), jnp.float32, -1.0, 1.0) / (float(fin) ** 0.5)
        params["fc"].append((wgt, bias))
    return params


def reference_forward(params, x_nchw, pool_every):
    """Pure-JAX (XLA) reference matching the PyTorch module semantics."""
    x = x_nchw
    for i, (w, b) in enumerate(params["conv"]):
        x = lax.conv_general_dilated(x, w, (1, 1), ((1, 1), (1, 1)),
                                     dimension_numbers=("NCHW", "HWIO", "NCHW"))
        x = jnp.maximum(x + b.reshape(1, -1, 1, 1), 0.0)
        if (i + 1) % pool_every == 0:
            x = lax.reduce_window(x, -jnp.inf, lax.max,
                                  (1, 1, 2, 2), (1, 1, 2, 2), "VALID")
    x = x.reshape(x.shape[0], -1)                      # torch.flatten (C,H,W) order
    n_fc = len(params["fc"])
    for j, (w, b) in enumerate(params["fc"]):
        x = x @ w + b
        if j < n_fc - 1:
            x = jnp.maximum(x, 0.0)
    return x


if __name__ == "__main__":
    # Config matching the PyTorch spec at small shapes.
    in_size = (4, 16, 16)          # (C, H, W)
    out_classes = 10
    filters = [8, 8]
    pool_every = 2
    hidden_dims = [32]
    batch = 2

    key = jax.random.PRNGKey(0)
    kx, kp = jax.random.split(key)
    x = jax.random.normal(kx, (batch,) + in_size, jnp.float32)   # NCHW input
    params = init_params(kp, in_size, out_classes, filters, pool_every, hidden_dims)

    # NOTE: the fused kernel is specialized to this architecture instance
    # (2 convs -> 1 pool -> 2 linears); deeper configs would repeat the same
    # banded-matmul stage recipe.
    packed = pack_operands(params, in_size[1], in_size[2], out_classes)

    fwd = jax.jit(functools.partial(fused_forward, out_classes=out_classes))
    logits = jax.block_until_ready(fwd(packed, x))
    assert logits.shape == (batch, out_classes), logits.shape
    assert bool(jnp.all(jnp.isfinite(logits)))

    ref = jax.block_until_ready(reference_forward(params, x, pool_every))
    max_err = float(jnp.max(jnp.abs(logits - ref)))
    assert max_err < 1e-4, f"kernel vs reference mismatch: {max_err}"

    print("KERNEL_OK")
</pallas_src>

<mosaic_0001>
module attributes {stable_mosaic.version = 11 : i64} {
  func.func @_fused_forward_kernel(%arg0: i32, %arg1: memref<1x18x128xf32, #tpu.memory_space<vmem>>, %arg2: memref<3x128x128xf32, #tpu.memory_space<vmem>>, %arg3: memref<1x128xf32, #tpu.memory_space<vmem>>, %arg4: memref<3x128x128xf32, #tpu.memory_space<vmem>>, %arg5: memref<1x128xf32, #tpu.memory_space<vmem>>, %arg6: memref<8x120x128xf32, #tpu.memory_space<vmem>>, %arg7: memref<1x128xf32, #tpu.memory_space<vmem>>, %arg8: memref<128x128xf32, #tpu.memory_space<vmem>>, %arg9: memref<1x128xf32, #tpu.memory_space<vmem>>, %arg10: memref<1x1x128xf32, #tpu.memory_space<vmem>>, %arg11: memref<18x128xf32, #tpu.memory_space<vmem>>) attributes {dimension_semantics = [#tpu.dimension_semantics<parallel>], iteration_bounds = array<i64: 2>, scalar_prefetch = 0 : i64, scratch_operands = 1 : i64, tpu.core_type = #tpu.core_type<tc>, window_params = [{transform_indices = @transform_0, window_bounds = array<i64: 1, 18, 128>}, {pipeline_mode = #tpu.pipeline_mode<synchronous>, transform_indices = @transform_1, window_bounds = array<i64: 3, 128, 128>}, {pipeline_mode = #tpu.pipeline_mode<synchronous>, transform_indices = @transform_2, window_bounds = array<i64: 1, 128>}, {pipeline_mode = #tpu.pipeline_mode<synchronous>, transform_indices = @transform_3, window_bounds = array<i64: 3, 128, 128>}, {pipeline_mode = #tpu.pipeline_mode<synchronous>, transform_indices = @transform_4, window_bounds = array<i64: 1, 128>}, {pipeline_mode = #tpu.pipeline_mode<synchronous>, transform_indices = @transform_5, window_bounds = array<i64: 8, 120, 128>}, {pipeline_mode = #tpu.pipeline_mode<synchronous>, transform_indices = @transform_6, window_bounds = array<i64: 1, 128>}, {pipeline_mode = #tpu.pipeline_mode<synchronous>, transform_indices = @transform_7, window_bounds = array<i64: 128, 128>}, {pipeline_mode = #tpu.pipeline_mode<synchronous>, transform_indices = @transform_8, window_bounds = array<i64: 1, 128>}, {transform_indices = @transform_9, window_bounds = array<i64: 1, 1, 128>}]} {
    %cst = arith.constant 0.000000e+00 : f32
    %0 = vector.broadcast %cst : f32 to vector<16x128xf32>
    %c0 = arith.constant 0 : index
    %c0_0 = arith.constant 0 : index
    %c0_1 = arith.constant 0 : index
    %1 = vector.load %arg1[%c0, %c0_0, %c0_1] : memref<1x18x128xf32, #tpu.memory_space<vmem>>, vector<1x16x128xf32>
    %2 = vector.shape_cast %1 : vector<1x16x128xf32> to vector<16x128xf32>
    %c0_2 = arith.constant 0 : index
    %c0_3 = arith.constant 0 : index
    %c0_4 = arith.constant 0 : index
    %3 = vector.load %arg2[%c0_2, %c0_3, %c0_4] : memref<3x128x128xf32, #tpu.memory_space<vmem>>, vector<1x128x128xf32>
    %4 = vector.shape_cast %3 : vector<1x128x128xf32> to vector<128x128xf32>
    %cst_5 = arith.constant dense<0.000000e+00> : vector<16x128xf32>
    %5 = tpu.matmul %2, %4, %cst_5 {dimension_numbers = #tpu.dot_dimension_numbers<[1], [0], [0], [1], [0, 0, 1, 1], [], []>} : vector<16x128xf32>, vector<128x128xf32>, vector<16x128xf32> -> vector<16x128xf32>
    %6 = arith.addf %0, %5 : vector<16x128xf32>
    %c0_6 = arith.constant 0 : index
    %c1 = arith.constant 1 : index
    %c0_7 = arith.constant 0 : index
    %7 = vector.load %arg1[%c0_6, %c1, %c0_7] : memref<1x18x128xf32, #tpu.memory_space<vmem>>, vector<1x16x128xf32>
    %8 = vector.shape_cast %7 : vector<1x16x128xf32> to vector<16x128xf32>
    %c1_8 = arith.constant 1 : index
    %c0_9 = arith.constant 0 : index
    %c0_10 = arith.constant 0 : index
    %9 = vector.load %arg2[%c1_8, %c0_9, %c0_10] : memref<3x128x128xf32, #tpu.memory_space<vmem>>, vector<1x128x128xf32>
    %10 = vector.shape_cast %9 : vector<1x128x128xf32> to vector<128x128xf32>
    %cst_11 = arith.constant dense<0.000000e+00> : vector<16x128xf32>
    %11 = tpu.matmul %8, %10, %cst_11 {dimension_numbers = #tpu.dot_dimension_numbers<[1], [0], [0], [1], [0, 0, 1, 1], [], []>} : vector<16x128xf32>, vector<128x128xf32>, vector<16x128xf32> -> vector<16x128xf32>
    %12 = arith.addf %6, %11 : vector<16x128xf32>
    %c0_12 = arith.constant 0 : index
    %c2 = arith.constant 2 : index
    %c0_13 = arith.constant 0 : index
    %13 = vector.load %arg1[%c0_12, %c2, %c0_13] : memref<1x18x128xf32, #tpu.memory_space<vmem>>, vector<1x16x128xf32>
    %14 = vector.shape_cast %13 : vector<1x16x128xf32> to vector<16x128xf32>
    %c2_14 = arith.constant 2 : index
    %c0_15 = arith.constant 0 : index
    %c0_16 = arith.constant 0 : index
    %15 = vector.load %arg2[%c2_14, %c0_15, %c0_16] : memref<3x128x128xf32, #tpu.memory_space<vmem>>, vector<1x128x128xf32>
    %16 = vector.shape_cast %15 : vector<1x128x128xf32> to vector<128x128xf32>
    %cst_17 = arith.constant dense<0.000000e+00> : vector<16x128xf32>
    %17 = tpu.matmul %14, %16, %cst_17 {dimension_numbers = #tpu.dot_dimension_numbers<[1], [0], [0], [1], [0, 0, 1, 1], [], []>} : vector<16x128xf32>, vector<128x128xf32>, vector<16x128xf32> -> vector<16x128xf32>
    %18 = arith.addf %12, %17 : vector<16x128xf32>
    %c0_18 = arith.constant 0 : index
    %c0_19 = arith.constant 0 : index
    %19 = vector.load %arg3[%c0_18, %c0_19] : memref<1x128xf32, #tpu.memory_space<vmem>>, vector<1x128xf32>
    %20 = vector.broadcast %19 : vector<1x128xf32> to vector<16x128xf32>
    %21 = arith.addf %18, %20 : vector<16x128xf32>
    %cst_20 = arith.constant 0.000000e+00 : f32
    %22 = vector.broadcast %cst_20 : f32 to vector<16x128xf32>
    %23 = arith.maximumf %21, %22 : vector<16x128xf32>
    %cst_21 = arith.constant 0.000000e+00 : f32
    %24 = vector.broadcast %cst_21 : f32 to vector<1x128xf32>
    %c0_22 = arith.constant 0 : index
    %c0_23 = arith.constant 0 : index
    %25 = vector.load %arg11[%c0_22, %c0_23] : memref<18x128xf32, #tpu.memory_space<vmem>>, vector<1x128xf32>
    tpu.vector_store %arg11[%c0_22, %c0_23], %24 {strides = array<i32>} : memref<18x128xf32, #tpu.memory_space<vmem>>, vector<1x128xf32>,
    %cst_24 = arith.constant 0.000000e+00 : f32
    %26 = vector.broadcast %cst_24 : f32 to vector<1x128xf32>
    %c17 = arith.constant 17 : index
    %c0_25 = arith.constant 0 : index
    %27 = vector.load %arg11[%c17, %c0_25] : memref<18x128xf32, #tpu.memory_space<vmem>>, vector<1x128xf32>
    tpu.vector_store %arg11[%c17, %c0_25], %26 {strides = array<i32>} : memref<18x128xf32, #tpu.memory_space<vmem>>, vector<1x128xf32>,
    %c1_26 = arith.constant 1 : index
    %c0_27 = arith.constant 0 : index
    %28 = vector.load %arg11[%c1_26, %c0_27] : memref<18x128xf32, #tpu.memory_space<vmem>>, vector<16x128xf32>
    tpu.vector_store %arg11[%c1_26, %c0_27], %23 {strides = array<i32>} : memref<18x128xf32, #tpu.memory_space<vmem>>, vector<16x128xf32>,
    %cst_28 = arith.constant 0.000000e+00 : f32
    %29 = vector.broadcast %cst_28 : f32 to vector<16x128xf32>
    %c0_29 = arith.constant 0 : index
    %c0_30 = arith.constant 0 : index
    %30 = vector.load %arg11[%c0_29, %c0_30] : memref<18x128xf32, #tpu.memory_space<vmem>>, vector<16x128xf32>
    %c0_31 = arith.constant 0 : index
    %c0_32 = arith.constant 0 : index
    %c0_33 = arith.constant 0 : index
    %31 = vector.load %arg4[%c0_31, %c0_32, %c0_33] : memref<3x128x128xf32, #tpu.memory_space<vmem>>, vector<1x128x128xf32>
    %32 = vector.shape_cast %31 : vector<1x128x128xf32> to vector<128x128xf32>
    %cst_34 = arith.constant dense<0.000000e+00> : vector<16x128xf32>
    %33 = tpu.matmul %30, %32, %cst_34 {dimension_numbers = #tpu.dot_dimension_numbers<[1], [0], [0], [1], [0, 0, 1, 1], [], []>} : vector<16x128xf32>, vector<128x128xf32>, vector<16x128xf32> -> vector<16x128xf32>
    %34 = arith.addf %29, %33 : vector<16x128xf32>
    %c1_35 = arith.constant 1 : index
    %c0_36 = arith.constant 0 : index
    %35 = vector.load %arg11[%c1_35, %c0_36] : memref<18x128xf32, #tpu.memory_space<vmem>>, vector<16x128xf32>
    %c1_37 = arith.constant 1 : index
    %c0_38 = arith.constant 0 : index
    %c0_39 = arith.constant 0 : index
    %36 = vector.load %arg4[%c1_37, %c0_38, %c0_39] : memref<3x128x128xf32, #tpu.memory_space<vmem>>, vector<1x128x128xf32>
    %37 = vector.shape_cast %36 : vector<1x128x128xf32> to vector<128x128xf32>
    %cst_40 = arith.constant dense<0.000000e+00> : vector<16x128xf32>
    %38 = tpu.matmul %35, %37, %cst_40 {dimension_numbers = #tpu.dot_dimension_numbers<[1], [0], [0], [1], [0, 0, 1, 1], [], []>} : vector<16x128xf32>, vector<128x128xf32>, vector<16x128xf32> -> vector<16x128xf32>
    %39 = arith.addf %34, %38 : vector<16x128xf32>
    %c2_41 = arith.constant 2 : index
    %c0_42 = arith.constant 0 : index
    %40 = vector.load %arg11[%c2_41, %c0_42] : memref<18x128xf32, #tpu.memory_space<vmem>>, vector<16x128xf32>
    %c2_43 = arith.constant 2 : index
    %c0_44 = arith.constant 0 : index
    %c0_45 = arith.constant 0 : index
    %41 = vector.load %arg4[%c2_43, %c0_44, %c0_45] : memref<3x128x128xf32, #tpu.memory_space<vmem>>, vector<1x128x128xf32>
    %42 = vector.shape_cast %41 : vector<1x128x128xf32> to vector<128x128xf32>
    %cst_46 = arith.constant dense<0.000000e+00> : vector<16x128xf32>
    %43 = tpu.matmul %40, %42, %cst_46 {dimension_numbers = #tpu.dot_dimension_numbers<[1], [0], [0], [1], [0, 0, 1, 1], [], []>} : vector<16x128xf32>, vector<128x128xf32>, vector<16x128xf32> -> vector<16x128xf32>
    %44 = arith.addf %39, %43 : vector<16x128xf32>
    %c0_47 = arith.constant 0 : index
    %c0_48 = arith.constant 0 : index
    %45 = vector.load %arg5[%c0_47, %c0_48] : memref<1x128xf32, #tpu.memory_space<vmem>>, vector<1x128xf32>
    %46 = vector.broadcast %45 : vector<1x128xf32> to vector<16x128xf32>
    %47 = arith.addf %44, %46 : vector<16x128xf32>
    %cst_49 = arith.constant 0.000000e+00 : f32
    %48 = vector.broadcast %cst_49 : f32 to vector<16x128xf32>
    %49 = arith.maximumf %47, %48 : vector<16x128xf32>
    %50 = vector.extract_strided_slice %49 {offsets = [0, 0], sizes = [15, 128], strides = [1, 1]} : vector<16x128xf32> to vector<15x128xf32>
    %51 = vector.extract_strided_slice %49 {offsets = [1, 0], sizes = [15, 128], strides = [1, 1]} : vector<16x128xf32> to vector<15x128xf32>
    %52 = arith.maximumf %50, %51 : vector<15x128xf32>
    %53 = vector.extract_strided_slice %52 {offsets = [0, 0], sizes = [15, 120], strides = [1, 1]} : vector<15x128xf32> to vector<15x120xf32>
    %54 = vector.extract_strided_slice %52 {offsets = [0, 8], sizes = [15, 120], strides = [1, 1]} : vector<15x128xf32> to vector<15x120xf32>
    %55 = arith.maximumf %53, %54 : vector<15x120xf32>
    %c0_50 = arith.constant 0 : index
    %c0_51 = arith.constant 0 : index
    %56 = vector.load %arg7[%c0_50, %c0_51] : memref<1x128xf32, #tpu.memory_space<vmem>>, vector<1x128xf32>
    %57 = vector.extract_strided_slice %55 {offsets = [0, 0], sizes = [1, 120], strides = [1, 1]} : vector<15x120xf32> to vector<1x120xf32>
    %c0_52 = arith.constant 0 : index
    %c0_53 = arith.constant 0 : index
    %c0_54 = arith.constant 0 : index
    %58 = vector.load %arg6[%c0_52, %c0_53, %c0_54] : memref<8x120x128xf32, #tpu.memory_space<vmem>>, vector<1x120x128xf32>
    %59 = vector.shape_cast %58 : vector<1x120x128xf32> to vector<120x128xf32>
    %cst_55 = arith.constant dense<0.000000e+00> : vector<1x128xf32>
    %60 = tpu.matmul %57, %59, %cst_55 {dimension_numbers = #tpu.dot_dimension_numbers<[1], [0], [0], [1], [0, 0, 1, 1], [], []>} : vector<1x120xf32>, vector<120x128xf32>, vector<1x128xf32> -> vector<1x128xf32>
    %61 = arith.addf %56, %60 : vector<1x128xf32>
    %62 = vector.extract_strided_slice %55 {offsets = [2, 0], sizes = [1, 120], strides = [1, 1]} : vector<15x120xf32> to vector<1x120xf32>
    %c1_56 = arith.constant 1 : index
    %c0_57 = arith.constant 0 : index
    %c0_58 = arith.constant 0 : index
    %63 = vector.load %arg6[%c1_56, %c0_57, %c0_58] : memref<8x120x128xf32, #tpu.memory_space<vmem>>, vector<1x120x128xf32>
    %64 = vector.shape_cast %63 : vector<1x120x128xf32> to vector<120x128xf32>
    %cst_59 = arith.constant dense<0.000000e+00> : vector<1x128xf32>
    %65 = tpu.matmul %62, %64, %cst_59 {dimension_numbers = #tpu.dot_dimension_numbers<[1], [0], [0], [1], [0, 0, 1, 1], [], []>} : vector<1x120xf32>, vector<120x128xf32>, vector<1x128xf32> -> vector<1x128xf32>
    %66 = arith.addf %61, %65 : vector<1x128xf32>
    %67 = vector.extract_strided_slice %55 {offsets = [4, 0], sizes = [1, 120], strides = [1, 1]} : vector<15x120xf32> to vector<1x120xf32>
    %c2_60 = arith.constant 2 : index
    %c0_61 = arith.constant 0 : index
    %c0_62 = arith.constant 0 : index
    %68 = vector.load %arg6[%c2_60, %c0_61, %c0_62] : memref<8x120x128xf32, #tpu.memory_space<vmem>>, vector<1x120x128xf32>
    %69 = vector.shape_cast %68 : vector<1x120x128xf32> to vector<120x128xf32>
    %cst_63 = arith.constant dense<0.000000e+00> : vector<1x128xf32>
    %70 = tpu.matmul %67, %69, %cst_63 {dimension_numbers = #tpu.dot_dimension_numbers<[1], [0], [0], [1], [0, 0, 1, 1], [], []>} : vector<1x120xf32>, vector<120x128xf32>, vector<1x128xf32> -> vector<1x128xf32>
    %71 = arith.addf %66, %70 : vector<1x128xf32>
    %72 = vector.extract_strided_slice %55 {offsets = [6, 0], sizes = [1, 120], strides = [1, 1]} : vector<15x120xf32> to vector<1x120xf32>
    %c3 = arith.constant 3 : index
    %c0_64 = arith.constant 0 : index
    %c0_65 = arith.constant 0 : index
    %73 = vector.load %arg6[%c3, %c0_64, %c0_65] : memref<8x120x128xf32, #tpu.memory_space<vmem>>, vector<1x120x128xf32>
    %74 = vector.shape_cast %73 : vector<1x120x128xf32> to vector<120x128xf32>
    %cst_66 = arith.constant dense<0.000000e+00> : vector<1x128xf32>
    %75 = tpu.matmul %72, %74, %cst_66 {dimension_numbers = #tpu.dot_dimension_numbers<[1], [0], [0], [1], [0, 0, 1, 1], [], []>} : vector<1x120xf32>, vector<120x128xf32>, vector<1x128xf32> -> vector<1x128xf32>
    %76 = arith.addf %71, %75 : vector<1x128xf32>
    %77 = vector.extract_strided_slice %55 {offsets = [8, 0], sizes = [1, 120], strides = [1, 1]} : vector<15x120xf32> to vector<1x120xf32>
    %c4 = arith.constant 4 : index
    %c0_67 = arith.constant 0 : index
    %c0_68 = arith.constant 0 : index
    %78 = vector.load %arg6[%c4, %c0_67, %c0_68] : memref<8x120x128xf32, #tpu.memory_space<vmem>>, vector<1x120x128xf32>
    %79 = vector.shape_cast %78 : vector<1x120x128xf32> to vector<120x128xf32>
    %cst_69 = arith.constant dense<0.000000e+00> : vector<1x128xf32>
    %80 = tpu.matmul %77, %79, %cst_69 {dimension_numbers = #tpu.dot_dimension_numbers<[1], [0], [0], [1], [0, 0, 1, 1], [], []>} : vector<1x120xf32>, vector<120x128xf32>, vector<1x128xf32> -> vector<1x128xf32>
    %81 = arith.addf %76, %80 : vector<1x128xf32>
    %82 = vector.extract_strided_slice %55 {offsets = [10, 0], sizes = [1, 120], strides = [1, 1]} : vector<15x120xf32> to vector<1x120xf32>
    %c5 = arith.constant 5 : index
    %c0_70 = arith.constant 0 : index
    %c0_71 = arith.constant 0 : index
    %83 = vector.load %arg6[%c5, %c0_70, %c0_71] : memref<8x120x128xf32, #tpu.memory_space<vmem>>, vector<1x120x128xf32>
    %84 = vector.shape_cast %83 : vector<1x120x128xf32> to vector<120x128xf32>
    %cst_72 = arith.constant dense<0.000000e+00> : vector<1x128xf32>
    %85 = tpu.matmul %82, %84, %cst_72 {dimension_numbers = #tpu.dot_dimension_numbers<[1], [0], [0], [1], [0, 0, 1, 1], [], []>} : vector<1x120xf32>, vector<120x128xf32>, vector<1x128xf32> -> vector<1x128xf32>
    %86 = arith.addf %81, %85 : vector<1x128xf32>
    %87 = vector.extract_strided_slice %55 {offsets = [12, 0], sizes = [1, 120], strides = [1, 1]} : vector<15x120xf32> to vector<1x120xf32>
    %c6 = arith.constant 6 : index
    %c0_73 = arith.constant 0 : index
    %c0_74 = arith.constant 0 : index
    %88 = vector.load %arg6[%c6, %c0_73, %c0_74] : memref<8x120x128xf32, #tpu.memory_space<vmem>>, vector<1x120x128xf32>
    %89 = vector.shape_cast %88 : vector<1x120x128xf32> to vector<120x128xf32>
    %cst_75 = arith.constant dense<0.000000e+00> : vector<1x128xf32>
    %90 = tpu.matmul %87, %89, %cst_75 {dimension_numbers = #tpu.dot_dimension_numbers<[1], [0], [0], [1], [0, 0, 1, 1], [], []>} : vector<1x120xf32>, vector<120x128xf32>, vector<1x128xf32> -> vector<1x128xf32>
    %91 = arith.addf %86, %90 : vector<1x128xf32>
    %92 = vector.extract_strided_slice %55 {offsets = [14, 0], sizes = [1, 120], strides = [1, 1]} : vector<15x120xf32> to vector<1x120xf32>
    %c7 = arith.constant 7 : index
    %c0_76 = arith.constant 0 : index
    %c0_77 = arith.constant 0 : index
    %93 = vector.load %arg6[%c7, %c0_76, %c0_77] : memref<8x120x128xf32, #tpu.memory_space<vmem>>, vector<1x120x128xf32>
    %94 = vector.shape_cast %93 : vector<1x120x128xf32> to vector<120x128xf32>
    %cst_78 = arith.constant dense<0.000000e+00> : vector<1x128xf32>
    %95 = tpu.matmul %92, %94, %cst_78 {dimension_numbers = #tpu.dot_dimension_numbers<[1], [0], [0], [1], [0, 0, 1, 1], [], []>} : vector<1x120xf32>, vector<120x128xf32>, vector<1x128xf32> -> vector<1x128xf32>
    %96 = arith.addf %91, %95 : vector<1x128xf32>
    %cst_79 = arith.constant 0.000000e+00 : f32
    %97 = vector.broadcast %cst_79 : f32 to vector<1x128xf32>
    %98 = arith.maximumf %96, %97 : vector<1x128xf32>
    %c0_80 = arith.constant 0 : index
    %c0_81 = arith.constant 0 : index
    %99 = vector.load %arg8[%c0_80, %c0_81] : memref<128x128xf32, #tpu.memory_space<vmem>>, vector<128x128xf32>
    %cst_82 = arith.constant dense<0.000000e+00> : vector<1x128xf32>
    %100 = tpu.matmul %98, %99, %cst_82 {dimension_numbers = #tpu.dot_dimension_numbers<[1], [0], [0], [1], [0, 0, 1, 1], [], []>} : vector<1x128xf32>, vector<128x128xf32>, vector<1x128xf32> -> vector<1x128xf32>
    %c0_83 = arith.constant 0 : index
    %c0_84 = arith.constant 0 : index
    %101 = vector.load %arg9[%c0_83, %c0_84] : memref<1x128xf32, #tpu.memory_space<vmem>>, vector<1x128xf32>
    %102 = arith.addf %100, %101 : vector<1x128xf32>
    %c0_85 = arith.constant 0 : index
    %c0_86 = arith.constant 0 : index
    %c0_87 = arith.constant 0 : index
    %103 = vector.load %arg10[%c0_85, %c0_86, %c0_87] : memref<1x1x128xf32, #tpu.memory_space<vmem>>, vector<1x1x128xf32>
    %104 = vector.shape_cast %103 : vector<1x1x128xf32> to vector<1x128xf32>
    %105 = vector.shape_cast %102 : vector<1x128xf32> to vector<1x1x128xf32>
    tpu.vector_store %arg10[%c0_85, %c0_86, %c0_87], %105 {strides = array<i32>} : memref<1x1x128xf32, #tpu.memory_space<vmem>>, vector<1x1x128xf32>,
    return
  }
  func.func @transform_0(%arg0: i32) -> (i32, i32, i32) {
    %c0_i32 = arith.constant 0 : i32
    %c0_i32_0 = arith.constant 0 : i32
    %c0_i32_1 = arith.constant 0 : i32
    return %arg0, %c0_i32, %c0_i32_0 : i32, i32, i32
  }
  func.func @transform_1(%arg0: i32) -> (i32, i32, i32) {
    %c0_i32 = arith.constant 0 : i32
    %c0_i32_0 = arith.constant 0 : i32
    %c0_i32_1 = arith.constant 0 : i32
    %c0_i32_2 = arith.constant 0 : i32
    return %c0_i32, %c0_i32_0, %c0_i32_1 : i32, i32, i32
  }
  func.func @transform_2(%arg0: i32) -> (i32, i32) {
    %c0_i32 = arith.constant 0 : i32
    %c0_i32_0 = arith.constant 0 : i32
    %c0_i32_1 = arith.constant 0 : i32
    return %c0_i32, %c0_i32_0 : i32, i32
  }
  func.func @transform_3(%arg0: i32) -> (i32, i32, i32) {
    %c0_i32 = arith.constant 0 : i32
    %c0_i32_0 = arith.constant 0 : i32
    %c0_i32_1 = arith.constant 0 : i32
    %c0_i32_2 = arith.constant 0 : i32
    return %c0_i32, %c0_i32_0, %c0_i32_1 : i32, i32, i32
  }
  func.func @transform_4(%arg0: i32) -> (i32, i32) {
    %c0_i32 = arith.constant 0 : i32
    %c0_i32_0 = arith.constant 0 : i32
    %c0_i32_1 = arith.constant 0 : i32
    return %c0_i32, %c0_i32_0 : i32, i32
  }
  func.func @transform_5(%arg0: i32) -> (i32, i32, i32) {
    %c0_i32 = arith.constant 0 : i32
    %c0_i32_0 = arith.constant 0 : i32
    %c0_i32_1 = arith.constant 0 : i32
    %c0_i32_2 = arith.constant 0 : i32
    return %c0_i32, %c0_i32_0, %c0_i32_1 : i32, i32, i32
  }
  func.func @transform_6(%arg0: i32) -> (i32, i32) {
    %c0_i32 = arith.constant 0 : i32
    %c0_i32_0 = arith.constant 0 : i32
    %c0_i32_1 = arith.constant 0 : i32
    return %c0_i32, %c0_i32_0 : i32, i32
  }
  func.func @transform_7(%arg0: i32) -> (i32, i32) {
    %c0_i32 = arith.constant 0 : i32
    %c0_i32_0 = arith.constant 0 : i32
    %c0_i32_1 = arith.constant 0 : i32
    return %c0_i32, %c0_i32_0 : i32, i32
  }
  func.func @transform_8(%arg0: i32) -> (i32, i32) {
    %c0_i32 = arith.constant 0 : i32
    %c0_i32_0 = arith.constant 0 : i32
    %c0_i32_1 = arith.constant 0 : i32
    return %c0_i32, %c0_i32_0 : i32, i32
  }
  func.func @transform_9(%arg0: i32) -> (i32, i32, i32) {
    %c0_i32 = arith.constant 0 : i32
    %c0_i32_0 = arith.constant 0 : i32
    %c0_i32_1 = arith.constant 0 : i32
    return %arg0, %c0_i32, %c0_i32_0 : i32, i32, i32
  }
}

</mosaic_0001>

<bundles_post_ra>
// kernel: fused_forward.1
= control target key start
LH: loop header
LB: loop body
LE: loop exit
PB: predicated region body
PF: predicated region fallthrough
CT: control target
= control target key end

     0   :  { %14 = vsyncpa [#allocation4], 0  ;;  %s3943_s0 = inlined_call_operand.vmem [shape: f32[2,18,128], index: 0, kind: input, shape index: {}]   ;;  %s3944_s1 = inlined_call_operand.vmem [shape: f32[3,128,128], index: 1, kind: input, shape index: {}]   ;;  %s3945_s2 = inlined_call_operand.hbm [shape: f32[1,128], index: 2, kind: input, shape index: {}]   ;;  %s3946_s3 = inlined_call_operand.hbm [shape: f32[3,128,128], index: 3, kind: input, shape index: {}]   ;;  %s3947_s4 = inlined_call_operand.vmem [shape: f32[1,128], index: 4, kind: input, shape index: {}]   ;;  %s3948_s5 = inlined_call_operand.hbm [shape: f32[8,120,128], index: 5, kind: input, shape index: {}]   ;;  %s3949_s6 = inlined_call_operand.vmem [shape: f32[1,128], index: 6, kind: input, shape index: {}]   ;;  %s3950_s7 = inlined_call_operand.vmem [shape: f32[128,128], index: 7, kind: input, shape index: {}]   ;;  %s3951_s8 = inlined_call_operand.vmem [shape: f32[1,128], index: 8, kind: input, shape index: {}]   ;;  %s3952_s9 = inlined_call_operand.hbm [shape: f32[2,1,128], index: 9, kind: output, shape index: {}]  }
   0x1   :  { %15 = vsyncpa [#allocation7], 0 }
   0x2   :  { %16 = vsyncpa [#allocation5], 0 }
   0x3   :  { %18 = vsyncpa [#allocation5 + $0x1], 0  ;;  %s3411_s30 = smov 0   ;;  %s3413_s10 = smov 0  }
   0x4   :  { %s3415_s11 = smov 0   ;;  %s3417_s12 = smov 0  }
   0x5 LB: > { %3961 = sst [smem:[#allocation13_spill]] %s3337_s30  ;;  %s3432_s13 = sadd.s32 4294967295, %s3349_s12   ;;  %s3349_s12 = sphi %s3417_s12, %s3980_s12   ;;  %s3345_s11 = sphi %s3415_s11, %s3982_s11   ;;  %s3341_s10 = sphi %s3413_s10, %s3984_s10   ;;  %s3337_s30 = sphi %s3411_s30, %s3983_s30  }
   0x6   : > { %3962 = sst [smem:[#allocation14_spill]] %s3345_s11  ;;  %s1893_s14 = sadd.s32 4294967294, %s3349_s12  }
   0x7   : > { %s3436_s15 = sadd.s32 1, %s3349_s12   ;;  %s225_s16 = sadd.s32 1, %s3345_s11 }
   0x8   : > { %3963 = sst [smem:[#allocation15_spill]] %s3436_s15  ;;  %s222_s17 = ssub.s32 %s3349_s12, %s3436_s15 }
   0x9   : > { %p235_p0 = scmp.ne.s32.totalorder %s3345_s11, %s3341_s10  ;;  %p223_p1 = scmp.eq.s32.totalorder %s222_s17, 0 }
   0xa   : > { %p236_p2 = scmp.eq.s32.totalorder %s3432_s13, 1  ;;  %p241_p3 = scmp.ne.s32.totalorder %s3341_s10, %s3337_s30 }
   0xb   : > { %p242_p4 = scmp.eq.s32.totalorder %s1893_s14, 1  ;;  %p1894_p7 = scmp.ge.s32.totalorder %s3349_s12, 1 }
   0xc   : > { %s3447_s18 = scalar_select %p223_p1, %s3345_s11, %s225_s16  }
   0xd   : > { %p3449_p5 = por %p236_p2, %p235_p0  ;;  %p3453_p6 = por %p242_p4, %p241_p3 }
   0xe   : > { %3964 = sst [smem:[#allocation16_spill]] %s3447_s18  ;;  %p249_p8 = scmp.lt.s32.totalorder %s3349_s12, 3 }
   0xf   : > { %s3965_s19 = scalar_select %p3449_p5, 1, 0 }
  0x10   : > { %s3966_s20 = scalar_select %p3453_p6, 1, 0 }
  0x11   : > { %p3953_p9 = scmp.eq.s32.totalorder %s3432_s13, 0  ;;  %p3460_p10 = pnand %p1894_p7, %p249_p8 }
  0x12   : > { %3967 = sst [smem:[#allocation17_spill]] %s3966_s20  ;;  %s3351_s22 = smov [#allocation6]  }
  0x13   : > { %s3968_s21 = scalar_select %p3460_p10, 1, 0 }
  0x14   : > { %s275_s23 = sshll.u32 %s3351_s22, 4  ;;  %p3133_p11 = pneg %p3460_p10  ;;  %s3466_s23 = int_to_ptr.vmem [resolvable:$true] %s275_s23 }
  0x15   : > { %s3352_s25 = smov [#allocation3]   ;;  %s3353_s27 = smov [#allocation8]  }
  0x16   : > { %p3470_p12 = pnand %p3953_p9, %p3133_p11  ;;  %s265_s26 = sshll.u32 %s3352_s25, 4  ;;  %s3474_s26 = int_to_ptr.vmem [resolvable:$true] %s265_s26 }
  0x17   : > { %s3476_s28 = sshll.u32 %s3353_s27, 4  ;;  %s3195_s16 = scalar_lea.hbm %s3946_s3, 6144  ;;  %s292_s28 = int_to_ptr.vmem [resolvable:$true] %s3476_s28 }
  0x18   : > { %p3196_p13 = scmp.ne.s32.totalorder %s3946_s3, %s3195_s16  ;;  %p3486_p0 = pneg %p3470_p12 }
  0x19   : > { %p3202_p3 = scmp.lt.u32.totalorder %s3195_s16, %s3946_s3 }
  0x1a   : > { %p3198_p1 = pnand %p3486_p0, %p3196_p13 }
  0x1c   : > { %p3199_p2 = pneg %p3198_p1 }
  0x1e   : > { %p3204_p4 = pnand %p3202_p3, %p3199_p2 }
  0x20   : > { %3207 = shalt.err (!%p3204_p4)
}
  0x21   : > { %s3208_s29 = scalar_lea.vmem %s3466_s23, 6144  ;;  %p3216_p9 = scmp.lt.s32.totalorder %s3466_s23, %s3466_s23 }
  0x22   : > { %p3209_p7 = scmp.ne.s32.totalorder %s3466_s23, %s3208_s29  ;;  %p3217_p6 = scmp.lt.s32.totalorder %s3208_s29, %s3208_s29 }
  0x24   : > { %p3211_p8 = pnand %p3209_p7, %p3486_p0  ;;  %p3218_p13 = por %p3217_p6, %p3216_p9 }
  0x26   : > { %p3212_p11 = pneg %p3211_p8 }
  0x28   : > { %p3219_p1 = pnand %p3218_p13, %p3212_p11 }
  0x2a   : > { %3222 = shalt.err (!%p3219_p1)
}
  0x2b   : > { %s3354_s14 = smov 128   ;;  %s3355_s16 = smov 8  }
  0x2c   : > { %3139 = dma.hbm_to_vmem [thread:$0]  (!%p3470_p12), %s3946_s3, 6144, %s3466_s23, [#allocation7], %s3354_s14, %s3354_s14, %s3355_s16  }
  0x2d   : > { %s3223_s29 = scalar_lea.hbm %s3945_s2, 16 }
  0x2e   : > { %p3224_p6 = scmp.ne.s32.totalorder %s3945_s2, %s3223_s29  ;;  %p3230_p3 = scmp.lt.u32.totalorder %s3223_s29, %s3945_s2 }
  0x30   : > { %p3226_p9 = pnand %p3224_p6, %p3486_p0 }
  0x32   : > { %p3227_p2 = pneg %p3226_p9 }
  0x34   : > { %p3232_p4 = pnand %p3230_p3, %p3227_p2 }
  0x36   : > { %3235 = shalt.err (!%p3232_p4)
}
  0x37   : > { %s3236_s23 = scalar_lea.vmem %s3474_s26, 16  ;;  %s3243_s11 = scalar_lea.vmem %s3474_s26, 32 }
  0x38   : > { %p3237_p7 = scmp.ne.s32.totalorder %s3474_s26, %s3236_s23  ;;  %p3244_p13 = scmp.lt.s32.totalorder %s3474_s26, %s3474_s26 }
  0x39   : > { %p3245_p1 = scmp.lt.s32.totalorder %s3243_s11, %s3236_s23 }
  0x3a   : > { %p3239_p8 = pnand %p3237_p7, %p3486_p0 }
  0x3b   : > { %p3246_p6 = por %p3245_p1, %p3244_p13 }
  0x3c   : > { %p3240_p11 = pneg %p3239_p8 }
  0x3e   : > { %p3247_p9 = pnand %p3246_p6, %p3240_p11 }
  0x40   : > { %3250 = shalt.err (!%p3247_p9)
}
  0x41   : > { %3136 = dma.hbm_to_vmem [thread:$0]  (!%p3470_p12), %s3945_s2, 16, %s3474_s26, [#allocation4]  }
  0x42   : > { %s3251_s22 = scalar_lea.hbm %s3948_s5, 15360 }
  0x43   : > { %p3252_p2 = scmp.ne.s32.totalorder %s3948_s5, %s3251_s22  ;;  %p3258_p7 = scmp.lt.u32.totalorder %s3251_s22, %s3948_s5 }
  0x45   : > { %p3254_p3 = pnand %p3252_p2, %p3486_p0 }
  0x47   : > { %p3255_p4 = pneg %p3254_p3 }
  0x49   : > { %p3260_p8 = pnand %p3258_p7, %p3255_p4 }
  0x4b   : > { %3263 = shalt.err (!%p3260_p8)
}
  0x4c   : > { %s3264_s11 = scalar_lea.vmem %s292_s28, 15360  ;;  %p3272_p6 = scmp.lt.s32.totalorder %s292_s28, %s292_s28 }
  0x4d   : > { %p3265_p11 = scmp.ne.s32.totalorder %s292_s28, %s3264_s11  ;;  %p3273_p9 = scmp.lt.s32.totalorder %s3264_s11, %s3264_s11 }
  0x4f   : > { %p3267_p13 = pnand %p3265_p11, %p3486_p0  ;;  %p3274_p5 = por %p3273_p9, %p3272_p6 }
  0x51   : > { %p3268_p1 = pneg %p3267_p13 }
  0x53   : > { %p3275_p10 = pnand %p3274_p5, %p3268_p1 }
  0x55   : > { %3278 = shalt.err (!%p3275_p10)
}
  0x56   : > { %3142 = dma.hbm_to_vmem [thread:$0]  (!%p3470_p12), %s3948_s5, 15360, %s292_s28, [#allocation7], %s3354_s14, %s3354_s14, %s3355_s16  }
  0x57   : > { %p3971_p2 = scmp.ne.s32.totalorder %s3968_s21, 0 }
  0x58   : > { %p3972_p0 = scmp.eq.s32.totalorder (!%p3971_p2), %s3432_s13, 0 }
  0x59   : > { %324 = sbr.rel (%p3971_p2) target bundleno = 1474 (0x5c2), region = 56 }
  0x60   : > { %3324 = dma.done.wait (%p3972_p0), [#allocation4], 16   ;;  %p3973_p3 = pmov %p3972_p0 }
  0x61   : > { %p3974_p5 = pmov %p3972_p0 }
  0x62   : > { %3326 = vsyncadd (%p3973_p3), [#allocation4], 4294967280 }
  0x63   : > { %3328 = dma.done.wait (%p3974_p5), [#allocation7], 21504   ;;  %p3975_p10 = pmov %p3972_p0 }
  0x64   : > { %p367_p4 = scmp.lt.s32.totalorder %s3432_s13, 1  ;;  %v1904_v0 = vld [vmem:[%s3944_s1 + $0x80] sm:$0xff]  ;;  %v1905_v1 = vld [vmem:[%s3944_s1 + $0x88] sm:$0xff]  ;;  %v1906_v2 = vld [vmem:[%s3944_s1 + $0x90] sm:$0xff]  ;;  %vm3358_vm0 = vmmov 0   ;;  %vm966_vm1 = vcmask 1046528  }
  0x65   : > { %3330 = vsyncadd (%p3975_p10), [#allocation7], 4294945792  ;;  %v2711_v3 = vpack.c.bf16 %v1905_v1, %v1904_v0  ;;  %v1907_v4 = vld [vmem:[%s3944_s1 + $0x98] sm:$0xff]  ;;  %v1908_v6 = vld [vmem:[%s3944_s1 + $0xa0] sm:$0xff]  ;;  %s3359_s16 = smov 120   ;;  %vm1000_vm2 = vcmask 982016  }
  0x66   : > { %s368_s18 = scalar_select %p367_p4, %s3432_s13, 1  ;;  %v2715_v5 = vpack.c.bf16 %v1907_v4, %v1906_v2  ;;  %v1909_v7 = vld [vmem:[%s3944_s1 + $0xa8] sm:$0xff]  ;;  %v1910_v10 = vld [vmem:[%s3944_s1 + $0xb0] sm:$0xff]  ;;  %v1911_v11 = vld [vmem:[%s3944_s1 + $0xb8] sm:$0xff] }
  0x67   : > { %2712 = vmatprep.subr.bf16.mxu1 %v2711_v3  ;;  %v2719_v8 = vpack.c.bf16 %v1909_v7, %v1908_v6  ;;  %v2723_v12 = vpack.c.bf16 %v1911_v11, %v1910_v10  ;;  %v1912_v13 = vld [vmem:[%s3944_s1 + $0xc0] sm:$0xff]  ;;  %v1913_v14 = vld [vmem:[%s3944_s1 + $0xc8] sm:$0xff]  ;;  %v1914_v16 = vld [vmem:[%s3944_s1 + $0xd0] sm:$0xff]  ;;  %s365_s15 = sand.u32 1, %s3341_s10   ;;  %s1946_s22 = sshll.u32 %s3432_s13, 4 }
  0x68   : > { %s3118_s24 = smul.u32 24, %s368_s18  ;;  %2714 = vmatpush3.bf16.msra.mxu1 %v2711_v3  ;;  %v2727_v15 = vpack.c.bf16 %v1913_v14, %v1912_v13  ;;  %v1915_v17 = vld [vmem:[%s3944_s1 + $0xd8] sm:$0xff]  ;;  %v1916_v19 = vld [vmem:[%s3944_s1 + $0xe0] sm:$0xff]  ;;  %v1917_v20 = vld [vmem:[%s3944_s1 + $0xe8] sm:$0xff]  ;;  %s366_s25 = scalar_lea.vmem [#allocation9], %s365_s15 }
  0x69   : > { %2716 = vmatprep.subr.bf16.mxu1 %v2715_v5  ;;  %v2731_v18 = vpack.c.bf16 %v1915_v17, %v1914_v16  ;;  %v2735_v21 = vpack.c.bf16 %v1917_v20, %v1916_v19  ;;  %v1918_v22 = vld [vmem:[%s3944_s1 + $0xf0] sm:$0xff]  ;;  %v1919_v23 = vld [vmem:[%s3944_s1 + $0xf8] sm:$0xff]  ;;  %v374_v25 = vld [vmem:[%s3944_s1] sm:$0xff]  ;;  %s1807_s27 = sshll.u32 %s366_s25, 4  ;;  %s3901_s11 = scalar_lea.hbm %s3952_s9, %s1946_s22  ;;  %s3903_s27 = int_to_ptr.vmem [resolvable:$true] %s1807_s27 }
  0x6a   : > { %s3589_s30 = scalar_lea.vmem %s3943_s0, %s3118_s24  ;;  %v2739_v24 = vpack.c.bf16 %v1919_v23, %v1918_v22  ;;  %v375_v26 = vld [vmem:[%s3944_s1 + $0x8] sm:$0xff]  ;;  %v376_v28 = vld [vmem:[%s3944_s1 + $0x10] sm:$0xff]  ;;  %v377_v29 = vld [vmem:[%s3944_s1 + $0x18] sm:$0xff]  ;;  %s1795_s26 = scalar_lea.sflag [#allocation5], %s365_s15 }
  0x6b   : > { %v390_v9 = vld [vmem:[%s3589_s30 + $0x1] sm:$0xff]  ;;  %v2743_v27 = vpack.c.bf16 %v375_v26, %v374_v25  ;;  %v391_v30 = vld [vmem:[%s3589_s30 + $0x9] sm:$0xff]  ;;  %v2747_v31 = vpack.c.bf16 %v377_v29, %v376_v28  ;;  %v381_v37 = vld [vmem:[%s3944_s1 + $0x38] sm:$0xff]  ;;  %s3279_s18 = scalar_lea.vmem %s3903_s27, 16  ;;  %p3976_p7 = scmp.ne.s32.totalorder %s3965_s19, 0 }
  0x6c   : > { %2234 = vmatprep.mubr.f32.mxu1 %v390_v9  ;;  %2718 = vmatpush3.bf16.msra.mxu1 %v2715_v5  ;;  %v372_v32 = vld [vmem:[%s3589_s30] sm:$0xff]  ;;  %v379_v34 = vld [vmem:[%s3944_s1 + $0x28] sm:$0xff]  ;;  %v380_v36 = vld [vmem:[%s3944_s1 + $0x30] sm:$0xff]  ;;  %p3280_p12 = scmp.ne.s32.totalorder %s3903_s27, %s3279_s18  ;;  %s3360_s13 = smov [#allocation9]  }
  0x6d   : > { %2720 = vmatprep.subr.bf16.mxu1 %v2719_v8  ;;  %v378_v33 = vld [vmem:[%s3944_s1 + $0x20] sm:$0xff]  ;;  %v2755_v38 = vpack.c.bf16 %v381_v37, %v380_v36  ;;  %v383_v40 = vld [vmem:[%s3944_s1 + $0x48] sm:$0xff]  ;;  %v384_v42 = vld [vmem:[%s3944_s1 + $0x50] sm:$0xff]  ;;  %s3283_s28 = sshll.u32 %s3360_s13, 4  ;;  %s3284_s28 = int_to_ptr.vmem [resolvable:$false] %s3283_s28 }
  0x6e   : > { %v2751_v35 = vpack.c.bf16 %v379_v34, %v378_v33  ;;  %v382_v39 = vld [vmem:[%s3944_s1 + $0x40] sm:$0xff]  ;;  %v385_v43 = vld [vmem:[%s3944_s1 + $0x58] sm:$0xff]  ;;  %v387_v46 = vld [vmem:[%s3944_s1 + $0x68] sm:$0xff]  ;;  %p3281_p8 = pnand %p3280_p12, %p3976_p7  ;;  %s3285_s21 = scalar_lea.vmem %s3284_s28, 32 }
  0x6f   : > { %v2759_v41 = vpack.c.bf16 %v383_v40, %v382_v39  ;;  %v2763_v44 = vpack.c.bf16 %v385_v43, %v384_v42  ;;  %v386_v45 = vld [vmem:[%s3944_s1 + $0x60] sm:$0xff]  ;;  %v388_v48 = vld [vmem:[%s3944_s1 + $0x70] sm:$0xff]  ;;  %v389_v49 = vld [vmem:[%s3944_s1 + $0x78] sm:$0xff]  ;;  %p3286_p13 = scmp.lt.s32.totalorder %s3903_s27, %s3284_s28  ;;  %p3287_p1 = scmp.lt.s32.totalorder %s3285_s21, %s3279_s18 }
  0x70   : > { %2722 = vmatpush3.bf16.msra.mxu1 %v2719_v8  ;;  %v2767_v47 = vpack.c.bf16 %v387_v46, %v386_v45  ;;  %v2771_v50 = vpack.c.bf16 %v389_v49, %v388_v48  ;;  %v1920_v51 = vld [vmem:[%s3944_s1 + $0x100] sm:$0xff]  ;;  %v1921_v52 = vld [vmem:[%s3944_s1 + $0x108] sm:$0xff]  ;;  %v1922_v54 = vld [vmem:[%s3944_s1 + $0x110] sm:$0xff]  ;;  %p3282_p11 = pneg %p3281_p8 }
  0x71   : > { %2724 = vmatprep.subr.bf16.mxu1 %v2723_v12  ;;  %v2775_v53 = vpack.c.bf16 %v1921_v52, %v1920_v51  ;;  %v1923_v55 = vld [vmem:[%s3944_s1 + $0x118] sm:$0xff]  ;;  %v373_v56 = vld [vmem:[%s3589_s30 + $0x8] sm:$0xff]  ;;  %v1924_v59 = vld [vmem:[%s3944_s1 + $0x120] sm:$0xff]  ;;  %p3288_p6 = por %p3287_p1, %p3286_p13 }
  0x72   : > { %v2779_v57 = vpack.c.bf16 %v1923_v55, %v1922_v54  ;;  %v559_v58 = vld [vmem:[%s3589_s30 + $0x2] sm:$0xff]  ;;  %v1926_v62 = vld [vmem:[%s3944_s1 + $0x130] sm:$0xff]  ;;  %v1927_v63 = vld [vmem:[%s3944_s1 + $0x138] sm:$0xff] }
  0x73   : > { %v1925_v60 = vld [vmem:[%s3944_s1 + $0x128] sm:$0xff]  ;;  %v2787_v0 = vpack.c.bf16 %v1927_v63, %v1926_v62  ;;  %v1928_v1 = vld [vmem:[%s3944_s1 + $0x140] sm:$0xff]  ;;  %v1930_v4 = vld [vmem:[%s3944_s1 + $0x150] sm:$0xff]  ;;  %p3289_p9 = pnand %p3288_p6, %p3282_p11 }
  0x74   : > { %2726 = vmatpush3.bf16.msra.mxu1 %v2723_v12  ;;  %v2783_v61 = vpack.c.bf16 %v1925_v60, %v1924_v59  ;;  %v1929_v2 = vld [vmem:[%s3944_s1 + $0x148] sm:$0xff]  ;;  %v1931_v5 = vld [vmem:[%s3944_s1 + $0x158] sm:$0xff]  ;;  %v1932_v7 = vld [vmem:[%s3944_s1 + $0x160] sm:$0xff] }
  0x75   : > { %2728 = vmatprep.subr.bf16.mxu1 %v2727_v15  ;;  %v2791_v3 = vpack.c.bf16 %v1929_v2, %v1928_v1  ;;  %v2795_v6 = vpack.c.bf16 %v1931_v5, %v1930_v4  ;;  %v1933_v8 = vld [vmem:[%s3944_s1 + $0x168] sm:$0xff]  ;;  %v1934_v10 = vld [vmem:[%s3944_s1 + $0x170] sm:$0xff]  ;;  %v1935_v11 = vld [vmem:[%s3944_s1 + $0x178] sm:$0xff] }
  0x76   : > { %v2799_v9 = vpack.c.bf16 %v1933_v8, %v1932_v7  ;;  %v2803_v12 = vpack.c.bf16 %v1935_v11, %v1934_v10  ;;  %v691_v13 = vld [vmem:[#allocation6 + $0x80] sm:$0xff]  ;;  %v692_v14 = vld [vmem:[#allocation6 + $0x88] sm:$0xff]  ;;  %v693_v16 = vld [vmem:[#allocation6 + $0x90] sm:$0xff] }
  0x77   : > { %v694_v17 = vld [vmem:[#allocation6 + $0x98] sm:$0xff]  ;;  %v695_v20 = vld [vmem:[#allocation6 + $0xa0] sm:$0xff]  ;;  %v697_v23 = vld [vmem:[#allocation6 + $0xb0] sm:$0xff] }
  0x78   : > { %2730 = vmatpush3.bf16.msra.mxu1 %v2727_v15  ;;  %v2807_v15 = vpack.c.bf16 %v692_v14, %v691_v13  ;;  %v2811_v19 = vpack.c.bf16 %v694_v17, %v693_v16  ;;  %v699_v26 = vld [vmem:[#allocation6 + $0xc0] sm:$0xff]  ;;  %v701_v29 = vld [vmem:[#allocation6 + $0xd0] sm:$0xff]  ;;  %v704_v33 = vld [vmem:[#allocation6 + $0xe8] sm:$0xff] }
  0x79   : > { %2732 = vmatprep.subr.bf16.mxu1 %v2731_v18  ;;  %v706_v36 = vld [vmem:[#allocation6 + $0xf8] sm:$0xff]  ;;  %v673_v39 = vld [vmem:[#allocation6 + $0x8] sm:$0xff]  ;;  %v676_v52 = vld [vmem:[#allocation6 + $0x20] sm:$0xff] }
  0x7a   : > { %v1936_v42 = vld [vmem:[#allocation3] ss:$0 sm:$0xff]  ;;  %v678_v55 = vld [vmem:[#allocation6 + $0x30] sm:$0xff]  ;;  %v680_v59 = vld [vmem:[#allocation6 + $0x40] sm:$0xff] }
  0x7b   : > { %v675_v48 = vld [vmem:[#allocation6 + $0x18] sm:$0xff]  ;;  %v681_v60 = vld [vmem:[#allocation6 + $0x48] sm:$0xff]  ;;  %v682_v62 = vld [vmem:[#allocation6 + $0x50] sm:$0xff] }
  0x7c   : > { %2734 = vmatpush3.bf16.msra.mxu1 %v2731_v18  ;;  %v560_v18 = vld [vmem:[%s3589_s30 + $0xa] sm:$0xff]  ;;  %v683_v63 = vld [vmem:[#allocation6 + $0x58] sm:$0xff]  ;;  %v684_v1 = vld [vmem:[#allocation6 + $0x60] sm:$0xff] }
  0x7d   : > { %2736 = vmatprep.subr.bf16.mxu1 %v2735_v21  ;;  %v685_v2 = vld [vmem:[#allocation6 + $0x68] sm:$0xff]  ;;  %v686_v4 = vld [vmem:[#allocation6 + $0x70] sm:$0xff]  ;;  %v687_v5 = vld [vmem:[#allocation6 + $0x78] sm:$0xff] }
  0x7e   : > { %v860_v7 = vld [vmem:[#allocation6 + $0x100] sm:$0xff]  ;;  %v861_v8 = vld [vmem:[#allocation6 + $0x108] sm:$0xff]  ;;  %v862_v10 = vld [vmem:[#allocation6 + $0x110] sm:$0xff] }
  0x7f   : > { %v863_v11 = vld [vmem:[#allocation6 + $0x118] sm:$0xff]  ;;  %v864_v14 = vld [vmem:[#allocation6 + $0x120] sm:$0xff] }
  0x80   : > { %2738 = vmatpush3.bf16.msra.mxu1 %v2735_v21  ;;  %v696_v21 = vld [vmem:[#allocation6 + $0xa8] sm:$0xff] }
  0x81   : > { %2740 = vmatprep.subr.bf16.mxu1 %v2739_v24  ;;  %v2815_v22 = vpack.c.bf16 %v696_v21, %v695_v20  ;;  %v868_v21 = vld [vmem:[#allocation6 + $0x140] sm:$0xff] }
  0x84   : > { %2742 = vmatpush3.bf16.msra.mxu1 %v2739_v24  ;;  %v698_v24 = vld [vmem:[#allocation6 + $0xb8] sm:$0xff] }
  0x85   : > { %2744 = vmatprep.subr.bf16.mxu1 %v2743_v27  ;;  %v2819_v25 = vpack.c.bf16 %v698_v24, %v697_v23  ;;  %v870_v24 = vld [vmem:[#allocation6 + $0x150] sm:$0xff] }
  0x87   : > { %2235 = vmatmul.mubr.f32.vlgmr.msra.gmra.mrb[0].mxu1 %v391_v30  ;;  %v702_v30 = vld [vmem:[#allocation6 + $0xd8] sm:$0xff] }
  0x88   : > { %2746 = vmatpush3.bf16.msra.mxu1 %v2743_v27  ;;  %2269 = vmatprep.mubr.f32.mxu1 %v372_v32  ;;  %v700_v27 = vld [vmem:[#allocation6 + $0xc8] sm:$0xff]  ;;  %v703_v32 = vld [vmem:[#allocation6 + $0xe0] sm:$0xff] }
  0x89   : > { %2748 = vmatprep.subr.bf16.mxu1 %v2747_v31  ;;  %v2823_v28 = vpack.c.bf16 %v700_v27, %v699_v26  ;;  %v2831_v34 = vpack.c.bf16 %v704_v33, %v703_v32  ;;  %v872_v27 = vld [vmem:[#allocation6 + $0x160] sm:$0xff] }
  0x8c   : > { %2750 = vmatpush3.bf16.msra.mxu1 %v2747_v31  ;;  %v2827_v31 = vpack.c.bf16 %v702_v30, %v701_v29  ;;  %v874_v30 = vld [vmem:[#allocation6 + $0x170] sm:$0xff] }
  0x8d   : > { %2752 = vmatprep.subr.bf16.mxu1 %v2751_v35 }
  0x90   : > { %2754 = vmatpush3.bf16.msra.mxu1 %v2751_v35  ;;  %v705_v35 = vld [vmem:[#allocation6 + $0xf0] sm:$0xff] }
  0x91   : > { %2756 = vmatprep.subr.bf16.mxu1 %v2755_v38  ;;  %v2835_v37 = vpack.c.bf16 %v706_v36, %v705_v35  ;;  %v986_v35 = vld [vmem:[#allocation8 + $0x8] sm:$0xff]  ;;  %v987_v36 = vld [vmem:[#allocation8 + $0x10] sm:$0xff] }
  0x94   : > { %2758 = vmatpush3.bf16.msra.mxu1 %v2755_v38  ;;  %v672_v38 = vld [vmem:[#allocation6] sm:$0xff] }
  0x95   : > { %2760 = vmatprep.subr.bf16.mxu1 %v2759_v41  ;;  %v2839_v40 = vpack.c.bf16 %v673_v39, %v672_v38  ;;  %v988_v39 = vld [vmem:[#allocation8 + $0x18] sm:$0xff] }
  0x98   : > { %2762 = vmatpush3.bf16.msra.mxu1 %v2759_v41  ;;  %v3356_v41 = vmov 0.0  }
  0x99   : > { %2764 = vmatprep.subr.bf16.mxu1 %v2763_v44  ;;  %666 = vst [vmem:[#allocation2] sm:$0x1] %v3356_v41  ;;  %667 = vst [vmem:[#allocation2 + $0x11] sm:$0x1] %v3356_v41  ;;  %2442 = vmatprep.mubr.msk.f32.mxu0 %vm3358_vm0, %v3356_v41 }
  0x9c   : > { %2766 = vmatpush3.bf16.msra.mxu1 %v2763_v44 }
  0x9d   : > { %2768 = vmatprep.subr.bf16.mxu1 %v2767_v47 }
  0xa0   : > { %2770 = vmatpush3.bf16.msra.mxu1 %v2767_v47  ;;  %v674_v47 = vld [vmem:[#allocation6 + $0x10] sm:$0xff] }
  0xa1   : > { %2772 = vmatprep.subr.bf16.mxu1 %v2771_v50  ;;  %v2843_v51 = vpack.c.bf16 %v675_v48, %v674_v47  ;;  %v993_v48 = vld [vmem:[#allocation8 + $0x40] sm:$0xff] }
  0xa4   : > { %2774 = vmatpush3.bf16.msra.mxu1 %v2771_v50 }
  0xa5   : > { %2776 = vmatprep.subr.bf16.mxu1 %v2775_v53 }
  0xa7   : > { %2270 = vmatmul.mubr.f32.vlgmr.msra.gmra.mrb[0].mxu1 %v373_v56  ;;  %v679_v56 = vld [vmem:[#allocation6 + $0x38] sm:$0xff] }
  0xa8   : > { %2778 = vmatpush3.bf16.msra.mxu1 %v2775_v53  ;;  %2304 = vmatprep.mubr.f32.mxu1 %v559_v58  ;;  %v677_v53 = vld [vmem:[#allocation6 + $0x28] sm:$0xff]  ;;  %v2851_v58 = vpack.c.bf16 %v679_v56, %v678_v55 }
  0xa9   : > { %2780 = vmatprep.subr.bf16.mxu1 %v2779_v57  ;;  %v2847_v54 = vpack.c.bf16 %v677_v53, %v676_v52  ;;  %v996_v52 = vld [vmem:[#allocation8 + $0x58] sm:$0xff]  ;;  %v998_v55 = vld [vmem:[#allocation8 + $0x68] sm:$0xff] }
  0xac   : > { %2782 = vmatpush3.bf16.msra.mxu1 %v2779_v57 }
  0xad   : > { %2784 = vmatprep.subr.bf16.mxu1 %v2783_v61 }
  0xb0   : > { %2786 = vmatpush3.bf16.msra.mxu1 %v2783_v61  ;;  %v2855_v61 = vpack.c.bf16 %v681_v60, %v680_v59 }
  0xb1   : > { %2788 = vmatprep.subr.bf16.mxu1 %v2787_v0 }
  0xb4   : > { %2790 = vmatpush3.bf16.msra.mxu1 %v2787_v0  ;;  %v2859_v0 = vpack.c.bf16 %v683_v63, %v682_v62 }
  0xb5   : > { %2792 = vmatprep.subr.bf16.mxu1 %v2791_v3 }
  0xb8   : > { %2794 = vmatpush3.bf16.msra.mxu1 %v2791_v3  ;;  %v2863_v3 = vpack.c.bf16 %v685_v2, %v684_v1 }
  0xb9   : > { %2796 = vmatprep.subr.bf16.mxu1 %v2795_v6 }
  0xbc   : > { %2798 = vmatpush3.bf16.msra.mxu1 %v2795_v6  ;;  %v2867_v6 = vpack.c.bf16 %v687_v5, %v686_v4 }
  0xbd   : > { %2800 = vmatprep.subr.bf16.mxu1 %v2799_v9 }
  0xc0   : > { %2802 = vmatpush3.bf16.msra.mxu1 %v2799_v9  ;;  %v2871_v9 = vpack.c.bf16 %v861_v8, %v860_v7  ;;  %v1077_v7 = vld [vmem:[#allocation8 + $0x80] sm:$0xff] }
  0xc1   : > { %2804 = vmatprep.subr.bf16.mxu1 %v2803_v12 }
  0xc4   : > { %2806 = vmatpush3.bf16.msra.mxu1 %v2803_v12  ;;  %v2875_v12 = vpack.c.bf16 %v863_v11, %v862_v10  ;;  %v1078_v11 = vld [vmem:[#allocation8 + $0x88] sm:$0xff] }
  0xc5   : > { %2808 = vmatprep.subr.bf16.mxu1 %v2807_v15 }
  0xc7   : > { %2305 = vmatmul.mubr.f32.vlgmr.msra.gmra.mrb[0].mxu1 %v560_v18  ;;  %v866_v18 = vld [vmem:[#allocation6 + $0x130] sm:$0xff] }
  0xc8   : > { %2810 = vmatpush3.bf16.msra.mxu1 %v2807_v15  ;;  %v865_v15 = vld [vmem:[#allocation6 + $0x128] sm:$0xff] }
  0xc9   : > { %2812 = vmatprep.subr.bf16.mxu1 %v2811_v19  ;;  %v2879_v17 = vpack.c.bf16 %v865_v15, %v864_v14  ;;  %v1080_v14 = vld [vmem:[#allocation8 + $0x98] sm:$0xff]  ;;  %v1081_v15 = vld [vmem:[#allocation8 + $0xa0] sm:$0xff] }
  0xcc   : > { %2814 = vmatpush3.bf16.msra.mxu1 %v2811_v19  ;;  %v867_v19 = vld [vmem:[#allocation6 + $0x138] sm:$0xff] }
  0xcd   : > { %2816 = vmatprep.subr.bf16.mxu1 %v2815_v22  ;;  %v2883_v20 = vpack.c.bf16 %v867_v19, %v866_v18  ;;  %v1083_v18 = vld [vmem:[#allocation8 + $0xb0] sm:$0xff] }
  0xd0   : > { %2818 = vmatpush3.bf16.msra.mxu1 %v2815_v22  ;;  %v869_v22 = vld [vmem:[#allocation6 + $0x148] sm:$0xff] }
  0xd1   : > { %2820 = vmatprep.subr.bf16.mxu1 %v2819_v25  ;;  %v2887_v23 = vpack.c.bf16 %v869_v22, %v868_v21  ;;  %v1085_v21 = vld [vmem:[#allocation8 + $0xc0] sm:$0xff] }
  0xd4   : > { %2822 = vmatpush3.bf16.msra.mxu1 %v2819_v25  ;;  %v871_v25 = vld [vmem:[#allocation6 + $0x158] sm:$0xff] }
  0xd5   : > { %2824 = vmatprep.subr.bf16.mxu1 %v2823_v28  ;;  %v2891_v26 = vpack.c.bf16 %v871_v25, %v870_v24  ;;  %v1087_v24 = vld [vmem:[#allocation8 + $0xd0] sm:$0xff] }
  0xd8   : > { %2826 = vmatpush3.bf16.msra.mxu1 %v2823_v28  ;;  %v873_v28 = vld [vmem:[#allocation6 + $0x168] sm:$0xff] }
  0xd9   : > { %2828 = vmatprep.subr.bf16.mxu1 %v2827_v31  ;;  %v2895_v29 = vpack.c.bf16 %v873_v28, %v872_v27  ;;  %v1089_v27 = vld [vmem:[#allocation8 + $0xe0] sm:$0xff] }
  0xdc   : > { %2830 = vmatpush3.bf16.msra.mxu1 %v2827_v31  ;;  %v875_v31 = vld [vmem:[#allocation6 + $0x178] sm:$0xff] }
  0xdd   : > { %2832 = vmatprep.subr.bf16.mxu1 %v2831_v34  ;;  %v2899_v32 = vpack.c.bf16 %v875_v31, %v874_v30  ;;  %v1167_v30 = vld [vmem:[#allocation8 + $0xf8] sm:$0xff]  ;;  %v1090_v31 = vld [vmem:[#allocation8 + $0xe8] sm:$0xff] }
  0xe0   : > { %2834 = vmatpush3.bf16.msra.mxu1 %v2831_v34  ;;  %v985_v34 = vld [vmem:[#allocation8] sm:$0xff] }
  0xe1   : > { %2836 = vmatprep.subr.bf16.mxu1 %v2835_v37  ;;  %v2904_v38 = vpack.c.bf16 %v986_v35, %v985_v34  ;;  %v1168_v34 = vld [vmem:[#allocation8 + $0x100] sm:$0xff]  ;;  %v1169_v35 = vld [vmem:[#allocation8 + $0x108] sm:$0xff] }
  0xe4   : > { %2838 = vmatpush3.bf16.msra.mxu1 %v2835_v37  ;;  %v3357_v37 = vmov 0.0|0.0  }
  0xe5   : > { %2840 = vmatprep.subr.bf16.mxu1 %v2839_v40  ;;  %2903 = vmatprep.subr.bf16.mxu0 %v3357_v37 }
  0xe6   : > { %2905 = vmatpush3.bf16.msra.mxu0 %v2904_v38  ;;  %v1170_v38 = vld [vmem:[#allocation8 + $0x110] sm:$0xff] }
  0xe7   : > { %2906 = vmatprep.subr.bf16.mxu0 %v3357_v37 }
 0x19a   : > { %v2306_v43 = vpop.f32.mrb[0].mxu1 }
 0x19b   : > { %v663_v44 = vadd.f32 %v2306_v43, %v1936_v42  ;;  %v644_v45 = vpop.f32.mrb[1].mxu1  ;;  %v990_v43 = vld [vmem:[#allocation8 + $0x28] sm:$0xff] }
 0x19c   : > { %v662_v46 = vadd.f32 %v1936_v42, %v644_v45  ;;  %v989_v42 = vld [vmem:[#allocation8 + $0x20] sm:$0xff]  ;;  %v991_v45 = vld [vmem:[#allocation8 + $0x30] sm:$0xff] }
 0x19d   : > { %v665_v49 = vmax.f32 %v663_v44, 0.0  ;;  %v2910_v44 = vpack.c.bf16 %v990_v43, %v989_v42  ;;  %v1172_v42 = vld [vmem:[#allocation8 + $0x120] sm:$0xff]  ;;  %v1173_v43 = vld [vmem:[#allocation8 + $0x128] sm:$0xff] }
 0x19e   : > { %v664_v50 = vmax.f32 %v662_v46, 0.0  ;;  %v992_v46 = vld [vmem:[#allocation8 + $0x38] sm:$0xff] }
 0x19f   : > { %669 = vst [vmem:[#allocation2 + $0x9] sm:$0xff] %v665_v49  ;;  %v2913_v47 = vpack.c.bf16 %v992_v46, %v991_v45  ;;  %v1174_v45 = vld [vmem:[#allocation8 + $0x130] sm:$0xff]  ;;  %v1175_v46 = vld [vmem:[#allocation8 + $0x138] sm:$0xff] }
 0x1a0   : > { %668 = vst [vmem:[#allocation2 + $0x1] sm:$0xff] %v664_v50  ;;  %2339 = vmatprep.mubr.f32.mxu1 %v664_v50 }
 0x1a1   : > { %2340 = vmatmul.mubr.f32.vlgmr.msra.gmra.mrb[2].mxu1 %v665_v49  ;;  %v994_v49 = vld [vmem:[#allocation8 + $0x48] sm:$0xff] }
 0x1a2   : > { %2842 = vmatpush3.bf16.msra.mxu1 %v2839_v40  ;;  %v2907_v40 = vpack.c.bf16 %v988_v39, %v987_v36  ;;  %v2916_v50 = vpack.c.bf16 %v994_v49, %v993_v48  ;;  %v2949_v36 = vpack.c.bf16 %v1169_v35, %v1168_v34  ;;  %v1171_v39 = vld [vmem:[#allocation8 + $0x118] sm:$0xff]  ;;  %v1176_v48 = vld [vmem:[#allocation8 + $0x140] sm:$0xff]  ;;  %v1177_v49 = vld [vmem:[#allocation8 + $0x148] sm:$0xff] }
 0x1a3   : > { %2844 = vmatprep.subr.bf16.mxu1 %v2843_v51  ;;  %v1351_v34 = vld [vmem:[#allocation8 + $0x208] sm:$0xff] }
 0x1a4   : > { %2908 = vmatpush3.bf16.msra.mxu0 %v2907_v40  ;;  %v2952_v40 = vpack.c.bf16 %v1171_v39, %v1170_v38  ;;  %v1715_v38 = vld [vmem:[%s3950_s7 + $0x48] sm:$0xff] }
 0x1a5   : > { %2909 = vmatprep.subr.bf16.mxu0 %v3357_v37 }
 0x1a6   : > { %2846 = vmatpush3.bf16.msra.mxu1 %v2843_v51  ;;  %v858_v33 = vld [vmem:[#allocation2 + $0xa] sm:$0xff] }
 0x1a7   : > { %v670_v57 = vld [vmem:[#allocation2] sm:$0xff]  ;;  %2848 = vmatprep.subr.bf16.mxu1 %v2847_v54  ;;  %v671_v13 = vld [vmem:[#allocation2 + $0x8] sm:$0xff] }
 0x1a8   : > { %2374 = vmatprep.mubr.f32.mxu1 %v670_v57  ;;  %v857_v16 = vld [vmem:[#allocation2 + $0x2] sm:$0xff]  ;;  %2911 = vmatpush3.bf16.msra.mxu0 %v2910_v44  ;;  %v995_v51 = vld [vmem:[#allocation8 + $0x50] sm:$0xff]  ;;  %v2955_v44 = vpack.c.bf16 %v1173_v43, %v1172_v42  ;;  %v1353_v42 = vld [vmem:[#allocation8 + $0x218] sm:$0xff] }
 0x1a9   : > { %2912 = vmatprep.subr.bf16.mxu0 %v3357_v37  ;;  %v2919_v53 = vpack.c.bf16 %v996_v52, %v995_v51  ;;  %v999_v57 = vld [vmem:[#allocation8 + $0x70] sm:$0xff]  ;;  %v1179_v52 = vld [vmem:[#allocation8 + $0x158] sm:$0xff] }
 0x1aa   : > { %2850 = vmatpush3.bf16.msra.mxu1 %v2847_v54  ;;  %v997_v54 = vld [vmem:[#allocation8 + $0x60] sm:$0xff]  ;;  %v1178_v51 = vld [vmem:[#allocation8 + $0x150] sm:$0xff] }
 0x1ab   : > { %2852 = vmatprep.subr.bf16.mxu1 %v2851_v58  ;;  %v2922_v56 = vpack.c.bf16 %v998_v55, %v997_v54  ;;  %v1256_v54 = vld [vmem:[#allocation8 + $0x168] sm:$0xff]  ;;  %v1257_v55 = vld [vmem:[#allocation8 + $0x170] sm:$0xff] }
 0x1ac   : > { %2914 = vmatpush3.bf16.msra.mxu0 %v2913_v47  ;;  %v2958_v47 = vpack.c.bf16 %v1175_v46, %v1174_v45  ;;  %v1717_v45 = vld [vmem:[%s3950_s7 + $0x58] sm:$0xff] }
 0x1ad   : > { %2915 = vmatprep.subr.bf16.mxu0 %v3357_v37 }
 0x1ae   : > { %2854 = vmatpush3.bf16.msra.mxu1 %v2851_v58  ;;  %v1937_v58 = vld [vmem:[%s3947_s4] ss:$0 sm:$0xff] }
 0x1af   : > { %2856 = vmatprep.subr.bf16.mxu1 %v2855_v61 }
 0x1b0   : > { %2917 = vmatpush3.bf16.msra.mxu0 %v2916_v50  ;;  %v2961_v50 = vpack.c.bf16 %v1177_v49, %v1176_v48  ;;  %v1355_v48 = vld [vmem:[#allocation8 + $0x228] sm:$0xff] }
 0x1b1   : > { %2918 = vmatprep.subr.bf16.mxu0 %v3357_v37 }
 0x1b2   : > { %2858 = vmatpush3.bf16.msra.mxu1 %v2855_v61 }
 0x1b3   : > { %2860 = vmatprep.subr.bf16.mxu1 %v2859_v0 }
 0x1b4   : > { %2920 = vmatpush3.bf16.msra.mxu0 %v2919_v53  ;;  %v2964_v53 = vpack.c.bf16 %v1179_v52, %v1178_v51  ;;  %v1719_v51 = vld [vmem:[%s3950_s7 + $0x68] sm:$0xff] }
 0x1b5   : > { %2921 = vmatprep.subr.bf16.mxu0 %v3357_v37 }
 0x1b6   : > { %2862 = vmatpush3.bf16.msra.mxu1 %v2859_v0 }
 0x1b7   : > { %2864 = vmatprep.subr.bf16.mxu1 %v2863_v3 }
 0x1b8   : > { %2923 = vmatpush3.bf16.msra.mxu0 %v2922_v56  ;;  %v1180_v56 = vld [vmem:[#allocation8 + $0x160] sm:$0xff] }
 0x1b9   : > { %2440 = vmatprep.subr.mxu0 %v3356_v41 }
 0x1ba   : > { %2866 = vmatpush3.bf16.msra.mxu1 %v2863_v3 }
 0x1bb   : > { %2868 = vmatprep.subr.bf16.mxu1 %v2867_v6 }
 0x1bc   : > { %2441 = vmatpush3.msra.mxu0 %v999_v57  ;;  %v2967_v57 = vpack.c.bf16 %v1257_v55, %v1256_v54  ;;  %v1357_v54 = vld [vmem:[#allocation8 + $0x238] sm:$0xff] }
 0x1bd   : > { %2924 = vmatprep.subr.bf16.mxu0 %v3357_v37 }
 0x1be   : > { %2870 = vmatpush3.bf16.msra.mxu1 %v2867_v6  ;;  %v1076_v6 = vld [vmem:[#allocation8 + $0x78] sm:$0xff] }
 0x1bf   : > { %2872 = vmatprep.subr.bf16.mxu1 %v2871_v9 }
 0x1c1   : > { %2375 = vmatmul.mubr.f32.vlgmr.msra.gmra.mrb[2].mxu1 %v671_v13 }
 0x1c2   : > { %2874 = vmatpush3.bf16.msra.mxu1 %v2871_v9  ;;  %2409 = vmatprep.mubr.f32.mxu1 %v857_v16  ;;  %v2925_v9 = vpack.c.bf16 %v1077_v7, %v1076_v6  ;;  %v2931_v16 = vpack.c.bf16 %v1081_v15, %v1080_v14  ;;  %v1265_v6 = vld [vmem:[#allocation8 + $0x1b0] sm:$0xff]  ;;  %v1706_v15 = vld [vmem:[%s3950_s7] sm:$0xff] }
 0x1c3   : > { %2876 = vmatprep.subr.bf16.mxu1 %v2875_v12 }
 0x1c6   : > { %2878 = vmatpush3.bf16.msra.mxu1 %v2875_v12  ;;  %v1079_v12 = vld [vmem:[#allocation8 + $0x90] sm:$0xff] }
 0x1c7   : > { %2880 = vmatprep.subr.bf16.mxu1 %v2879_v17  ;;  %v2928_v13 = vpack.c.bf16 %v1079_v12, %v1078_v11  ;;  %v1268_v12 = vld [vmem:[#allocation8 + $0x1c8] sm:$0xff] }
 0x1ca   : > { %2882 = vmatpush3.bf16.msra.mxu1 %v2879_v17  ;;  %v1082_v17 = vld [vmem:[#allocation8 + $0xa8] sm:$0xff] }
 0x1cb   : > { %2884 = vmatprep.subr.bf16.mxu1 %v2883_v20  ;;  %v2934_v19 = vpack.c.bf16 %v1083_v18, %v1082_v17  ;;  %v1708_v17 = vld [vmem:[%s3950_s7 + $0x10] sm:$0xff] }
 0x1ce   : > { %2886 = vmatpush3.bf16.msra.mxu1 %v2883_v20  ;;  %v1084_v20 = vld [vmem:[#allocation8 + $0xb8] sm:$0xff] }
 0x1cf   : > { %2888 = vmatprep.subr.bf16.mxu1 %v2887_v23  ;;  %v2937_v22 = vpack.c.bf16 %v1085_v21, %v1084_v20  ;;  %v1346_v20 = vld [vmem:[#allocation8 + $0x1e0] sm:$0xff]  ;;  %v1347_v21 = vld [vmem:[#allocation8 + $0x1e8] sm:$0xff] }
 0x1d2   : > { %2890 = vmatpush3.bf16.msra.mxu1 %v2887_v23  ;;  %v1086_v23 = vld [vmem:[#allocation8 + $0xc8] sm:$0xff] }
 0x1d3   : > { %2892 = vmatprep.subr.bf16.mxu1 %v2891_v26  ;;  %v2940_v25 = vpack.c.bf16 %v1087_v24, %v1086_v23  ;;  %v1270_v23 = vld [vmem:[#allocation8 + $0x1d8] sm:$0xff]  ;;  %v1710_v24 = vld [vmem:[%s3950_s7 + $0x20] sm:$0xff] }
 0x1d6   : > { %2894 = vmatpush3.bf16.msra.mxu1 %v2891_v26  ;;  %v1088_v26 = vld [vmem:[#allocation8 + $0xd8] sm:$0xff] }
 0x1d7   : > { %2896 = vmatprep.subr.bf16.mxu1 %v2895_v29  ;;  %v2943_v28 = vpack.c.bf16 %v1089_v27, %v1088_v26  ;;  %v2988_v26 = vpack.c.bf16 %v1347_v21, %v1346_v20  ;;  %v1526_v21 = vld [vmem:[#allocation8 + $0x2d0] sm:$0xff] }
 0x1da   : > { %2898 = vmatpush3.bf16.msra.mxu1 %v2895_v29  ;;  %v1166_v29 = vld [vmem:[#allocation8 + $0xf0] sm:$0xff] }
 0x1db   : > { %2900 = vmatprep.subr.bf16.mxu1 %v2899_v32 }
 0x1de   : > { %2902 = vmatpush3.bf16.msra.mxu1 %v2899_v32  ;;  %v2946_v32 = vpack.c.bf16 %v1167_v30, %v1166_v29  ;;  %v1349_v29 = vld [vmem:[#allocation8 + $0x1f8] sm:$0xff] }
 0x1df   : > { %3071 = vmatprep.subr.bf16.mxu1 %v3357_v37 }
 0x1e1   : > { %2410 = vmatmul.mubr.f32.vlgmr.msra.gmra.mrb[2].mxu1 %v858_v33 }
 0x1e2   : > { %2708 = vmatprep.mubr.msk.f32.mxu1 %vm3358_vm0, %v3356_v41 }
 0x2b4   : > { %v2411_v59 = vpop.f32.mrb[2].mxu1 }
 0x2b5   : > { %v961_v60 = vadd.f32 %v2411_v59, %v1937_v58  ;;  %v942_v61 = vpop.f32.mrb[3].mxu1  ;;  %v1258_v59 = vld [vmem:[#allocation8 + $0x178] sm:$0xff] }
 0x2b6   : > { %v960_v62 = vadd.f32 %v1937_v58, %v942_v61 }
 0x2b7   : > { %v963_v63 = vmax.f32 %v961_v60, 0.0  ;;  %v1259_v60 = vld [vmem:[#allocation8 + $0x180] sm:$0xff] }
 0x2b8   : > { %v962_v0 = vmax.f32 %v960_v62, 0.0  ;;  %v2970_v61 = vpack.c.bf16 %v1259_v60, %v1258_v59  ;;  %v1260_v62 = vld [vmem:[#allocation8 + $0x188] sm:$0xff]  ;;  %v1436_v60 = vld [vmem:[#allocation8 + $0x258] sm:$0xff] }
 0x2b9   : > { %v968_v1 = vrot.slane %v963_v63, 1 }
 0x2ba   : > { %v967_v2 = vrot.slane %v962_v0, 1 }
 0x2bb   : > { %v3742_v5 = vmax.f32 %v963_v63, %v968_v1  ;;  %v1261_v63 = vld [vmem:[#allocation8 + $0x190] sm:$0xff] }
 0x2bc   : > { %v969_v3 = vsel %vm966_vm1, %v967_v2, %v968_v1  ;;  %v1262_v1 = vld [vmem:[#allocation8 + $0x198] sm:$0xff]  ;;  %v1263_v2 = vld [vmem:[#allocation8 + $0x1a0] sm:$0xff] }
 0x2bd   : > { %v972_v4 = vmax.f32 %v962_v0, %v969_v3  ;;  %v2973_v0 = vpack.c.bf16 %v1261_v63, %v1260_v62  ;;  %v2976_v3 = vpack.c.bf16 %v1263_v2, %v1262_v1  ;;  %v1360_v63 = vld [vmem:[#allocation8 + $0x250] sm:$0xff]  ;;  %v1438_v2 = vld [vmem:[#allocation8 + $0x268] sm:$0xff] }
 0x2bf   : > { %976 = vrot.lane.b32.xlu0 %v972_v4, %s3359_s16 }
 0x2c3   : > { %978 = vrot.lane.b32.xlu0 %v3742_v5, %s3359_s16 }
 0x331   : > { %v977_v8 = vpop.permute.xlu0 %976 }
 0x332   : > { %v3745_v10 = vmax.f32 %v972_v4, %v977_v8  ;;  %v1264_v4 = vld [vmem:[#allocation8 + $0x1a8] sm:$0xff]  ;;  %v1266_v8 = vld [vmem:[#allocation8 + $0x1b8] sm:$0xff] }
 0x333   : > { %v2979_v7 = vpack.c.bf16 %v1265_v6, %v1264_v4  ;;  %v1440_v6 = vld [vmem:[#allocation8 + $0x278] sm:$0xff] }
 0x334   : > { %2443 = vmatmul.mubr.msk.f32.vlgmr.msra.gmra.mrb[0].mxu0 %vm1000_vm2, %v3745_v10  ;;  %v1091_v33 = vrot.slane %v3745_v10, 2  ;;  %v1181_v58 = vrot.slane %v3745_v10, 4  ;;  %v1271_v27 = vrot.slane %v3745_v10, 6  ;;  %v1350_v10 = vld [vmem:[#allocation8 + $0x200] sm:$0xff] }
 0x335   : > { %2926 = vmatpush3.bf16.msra.mxu0 %v2925_v9  ;;  %2475 = vmatprep.mubr.msk.f32.mxu0 %vm3358_vm0, %v3356_v41  ;;  %v1267_v9 = vld [vmem:[#allocation8 + $0x1c0] sm:$0xff]  ;;  %v2994_v39 = vpack.c.bf16 %v1351_v34, %v1350_v10  ;;  %v979_v62 = vpop.permute.xlu0 %978  ;;  %v1534_v34 = vld [vmem:[#allocation8 + $0x310] sm:$0xff] }
 0x336   : > { %2927 = vmatprep.subr.bf16.mxu0 %v3357_v37  ;;  %v2982_v11 = vpack.c.bf16 %v1267_v9, %v1266_v8  ;;  %v3844_v1 = vmax.f32 %v3742_v5, %v979_v62  ;;  %v1442_v8 = vld [vmem:[#allocation8 + $0x288] sm:$0xff]  ;;  %v1443_v9 = vld [vmem:[#allocation8 + $0x290] sm:$0xff]  ;;  %v1626_v62 = vld [vmem:[#allocation8 + $0x398] sm:$0xff] }
 0x339   : > { %2929 = vmatpush3.bf16.msra.mxu0 %v2928_v13  ;;  %v1269_v13 = vld [vmem:[#allocation8 + $0x1d0] sm:$0xff] }
 0x33a   : > { %2930 = vmatprep.subr.bf16.mxu0 %v3357_v37  ;;  %v2985_v14 = vpack.c.bf16 %v1269_v13, %v1268_v12  ;;  %v1444_v12 = vld [vmem:[#allocation8 + $0x298] sm:$0xff]  ;;  %v1445_v13 = vld [vmem:[#allocation8 + $0x2a0] sm:$0xff] }
 0x33d   : > { %2932 = vmatpush3.bf16.msra.mxu0 %v2931_v16  ;;  %v1707_v16 = vld [vmem:[%s3950_s7 + $0x8] sm:$0xff] }
 0x33e   : > { %2933 = vmatprep.subr.bf16.mxu0 %v3357_v37  ;;  %v3072_v18 = vpack.c.bf16 %v1707_v16, %v1706_v15  ;;  %v1446_v15 = vld [vmem:[#allocation8 + $0x2a8] sm:$0xff]  ;;  %v1447_v16 = vld [vmem:[#allocation8 + $0x2b0] sm:$0xff] }
 0x340   : > { %3073 = vmatpush3.bf16.msra.mxu1 %v3072_v18  ;;  %v1448_v18 = vld [vmem:[#allocation8 + $0x2b8] sm:$0xff] }
 0x341   : > { %2935 = vmatpush3.bf16.msra.mxu0 %v2934_v19  ;;  %v1709_v19 = vld [vmem:[%s3950_s7 + $0x18] sm:$0xff]  ;;  %3074 = vmatprep.subr.bf16.mxu1 %v3357_v37 }
 0x342   : > { %2936 = vmatprep.subr.bf16.mxu0 %v3357_v37 }
 0x345   : > { %2938 = vmatpush3.bf16.msra.mxu0 %v2937_v22  ;;  %v3075_v22 = vpack.c.bf16 %v1709_v19, %v1708_v17  ;;  %v3024_v17 = vpack.c.bf16 %v1447_v16, %v1446_v15  ;;  %v1449_v19 = vld [vmem:[#allocation8 + $0x2c0] sm:$0xff] }
 0x346   : > { %2939 = vmatprep.subr.bf16.mxu0 %v3357_v37  ;;  %v3027_v20 = vpack.c.bf16 %v1449_v19, %v1448_v18 }
 0x347   : > { %3076 = vmatpush3.bf16.msra.mxu1 %v3075_v22  ;;  %v1527_v22 = vld [vmem:[#allocation8 + $0x2d8] sm:$0xff] }
 0x348   : > { %3077 = vmatprep.subr.bf16.mxu1 %v3357_v37 }
 0x349   : > { %2941 = vmatpush3.bf16.msra.mxu0 %v2940_v25  ;;  %v1711_v25 = vld [vmem:[%s3950_s7 + $0x28] sm:$0xff] }
 0x34a   : > { %2942 = vmatprep.subr.bf16.mxu0 %v3357_v37  ;;  %v3078_v30 = vpack.c.bf16 %v1711_v25, %v1710_v24  ;;  %v3030_v24 = vpack.c.bf16 %v1527_v22, %v1526_v21  ;;  %v1451_v25 = vrot.slane %v3844_v1, 2 }
 0x34c   : > { %3079 = vmatpush3.bf16.msra.mxu1 %v3078_v30  ;;  %v1531_v30 = vld [vmem:[#allocation8 + $0x2f8] sm:$0xff] }
 0x34d   : > { %2944 = vmatpush3.bf16.msra.mxu0 %v2943_v28  ;;  %v1348_v28 = vld [vmem:[#allocation8 + $0x1f0] sm:$0xff]  ;;  %3080 = vmatprep.subr.bf16.mxu1 %v3357_v37 }
 0x34e   : > { %2473 = vmatprep.subr.mxu0 %v3356_v41 }
 0x351   : > { %2474 = vmatpush3.msra.mxu0 %v1090_v31  ;;  %v1712_v31 = vld [vmem:[%s3950_s7 + $0x30] sm:$0xff] }
 0x352   : > { %2476 = vmatmul.mubr.msk.f32.vlgmr.msra.gmra.mrb[0].mxu0 %vm1000_vm2, %v1091_v33  ;;  %2945 = vmatprep.subr.bf16.mxu0 %v3357_v37  ;;  %v2991_v33 = vpack.c.bf16 %v1349_v29, %v1348_v28  ;;  %v1530_v29 = vld [vmem:[#allocation8 + $0x2f0] sm:$0xff] }
 0x353   : > { %2947 = vmatpush3.bf16.msra.mxu0 %v2946_v32  ;;  %2508 = vmatprep.mubr.msk.f32.mxu0 %vm3358_vm0, %v3356_v41  ;;  %v1713_v32 = vld [vmem:[%s3950_s7 + $0x38] sm:$0xff] }
 0x354   : > { %2948 = vmatprep.subr.bf16.mxu0 %v3357_v37  ;;  %v3081_v35 = vpack.c.bf16 %v1713_v32, %v1712_v31  ;;  %v3036_v31 = vpack.c.bf16 %v1531_v30, %v1530_v29  ;;  %v1532_v32 = vld [vmem:[#allocation8 + $0x300] sm:$0xff] }
 0x356   : > { %3082 = vmatpush3.bf16.msra.mxu1 %v3081_v35  ;;  %v1535_v35 = vld [vmem:[#allocation8 + $0x318] sm:$0xff] }
 0x357   : > { %2950 = vmatpush3.bf16.msra.mxu0 %v2949_v36  ;;  %v1714_v36 = vld [vmem:[%s3950_s7 + $0x40] sm:$0xff]  ;;  %3083 = vmatprep.subr.bf16.mxu1 %v3357_v37 }
 0x358   : > { %2951 = vmatprep.subr.bf16.mxu0 %v3357_v37  ;;  %v3084_v43 = vpack.c.bf16 %v1715_v38, %v1714_v36  ;;  %v3042_v36 = vpack.c.bf16 %v1535_v35, %v1534_v34  ;;  %v1536_v38 = vld [vmem:[#allocation8 + $0x320] sm:$0xff] }
 0x35a   : > { %3085 = vmatpush3.bf16.msra.mxu1 %v3084_v43  ;;  %v1539_v43 = vld [vmem:[#allocation8 + $0x338] sm:$0xff] }
 0x35b   : > { %2953 = vmatpush3.bf16.msra.mxu0 %v2952_v40  ;;  %v1352_v40 = vld [vmem:[#allocation8 + $0x210] sm:$0xff]  ;;  %3086 = vmatprep.subr.bf16.mxu1 %v3357_v37 }
 0x35c   : > { %2954 = vmatprep.subr.bf16.mxu0 %v3357_v37  ;;  %v2997_v46 = vpack.c.bf16 %v1353_v42, %v1352_v40  ;;  %v1538_v42 = vld [vmem:[#allocation8 + $0x330] sm:$0xff] }
 0x35f   : > { %2956 = vmatpush3.bf16.msra.mxu0 %v2955_v44  ;;  %v1716_v44 = vld [vmem:[%s3950_s7 + $0x50] sm:$0xff] }
 0x360   : > { %2957 = vmatprep.subr.bf16.mxu0 %v3357_v37  ;;  %v3087_v49 = vpack.c.bf16 %v1717_v45, %v1716_v44  ;;  %v3048_v44 = vpack.c.bf16 %v1539_v43, %v1538_v42  ;;  %v1616_v45 = vld [vmem:[#allocation8 + $0x348] sm:$0xff] }
 0x362   : > { %3088 = vmatpush3.bf16.msra.mxu1 %v3087_v49  ;;  %v1541_v49 = vrot.slane %v3844_v1, 4 }
 0x363   : > { %2959 = vmatpush3.bf16.msra.mxu0 %v2958_v47  ;;  %v1354_v47 = vld [vmem:[#allocation8 + $0x220] sm:$0xff]  ;;  %3089 = vmatprep.subr.bf16.mxu1 %v3357_v37 }
 0x364   : > { %2960 = vmatprep.subr.bf16.mxu0 %v3357_v37  ;;  %v3000_v52 = vpack.c.bf16 %v1355_v48, %v1354_v47  ;;  %v1540_v47 = vld [vmem:[#allocation8 + $0x340] sm:$0xff] }
 0x367   : > { %2962 = vmatpush3.bf16.msra.mxu0 %v2961_v50  ;;  %v1718_v50 = vld [vmem:[%s3950_s7 + $0x60] sm:$0xff] }
 0x368   : > { %2963 = vmatprep.subr.bf16.mxu0 %v3357_v37  ;;  %v3090_v55 = vpack.c.bf16 %v1719_v51, %v1718_v50  ;;  %v1618_v50 = vld [vmem:[#allocation8 + $0x358] sm:$0xff]  ;;  %v1619_v51 = vld [vmem:[#allocation8 + $0x360] sm:$0xff] }
 0x36a   : > { %3091 = vmatpush3.bf16.msra.mxu1 %v3090_v55 }
 0x36b   : > { %2965 = vmatpush3.bf16.msra.mxu0 %v2964_v53  ;;  %v1356_v53 = vld [vmem:[#allocation8 + $0x230] sm:$0xff]  ;;  %3092 = vmatprep.subr.bf16.mxu1 %v3357_v37 }
 0x36c   : > { %2506 = vmatprep.subr.mxu0 %v3356_v41 }
 0x36f   : > { %2507 = vmatpush3.msra.mxu0 %v1180_v56  ;;  %v3003_v56 = vpack.c.bf16 %v1357_v54, %v1356_v53  ;;  %v1620_v53 = vld [vmem:[#allocation8 + $0x368] sm:$0xff]  ;;  %v1621_v54 = vld [vmem:[#allocation8 + $0x370] sm:$0xff] }
 0x370   : > { %2509 = vmatmul.mubr.msk.f32.vlgmr.msra.gmra.mrb[0].mxu0 %vm1000_vm2, %v1181_v58  ;;  %2966 = vmatprep.subr.bf16.mxu0 %v3357_v37  ;;  %v1359_v58 = vld [vmem:[#allocation8 + $0x248] sm:$0xff]  ;;  %v3057_v55 = vpack.c.bf16 %v1621_v54, %v1620_v53 }
 0x371   : > { %2968 = vmatpush3.bf16.msra.mxu0 %v2967_v57  ;;  %2541 = vmatprep.mubr.msk.f32.mxu0 %vm3358_vm0, %v3356_v41  ;;  %v1358_v57 = vld [vmem:[#allocation8 + $0x240] sm:$0xff] }
 0x372   : > { %2969 = vmatprep.subr.bf16.mxu0 %v3357_v37  ;;  %v3006_v59 = vpack.c.bf16 %v1359_v58, %v1358_v57  ;;  %v1623_v57 = vld [vmem:[#allocation8 + $0x380] sm:$0xff] }
 0x375   : > { %2971 = vmatpush3.bf16.msra.mxu0 %v2970_v61  ;;  %v1437_v61 = vld [vmem:[#allocation8 + $0x260] sm:$0xff] }
 0x376   : > { %2972 = vmatprep.subr.bf16.mxu0 %v3357_v37 }
 0x379   : > { %2974 = vmatpush3.bf16.msra.mxu0 %v2973_v0  ;;  %v3009_v0 = vpack.c.bf16 %v1437_v61, %v1436_v60  ;;  %v1625_v60 = vld [vmem:[#allocation8 + $0x390] sm:$0xff] }
 0x37a   : > { %2975 = vmatprep.subr.bf16.mxu0 %v3357_v37 }
 0x37d   : > { %2977 = vmatpush3.bf16.msra.mxu0 %v2976_v3  ;;  %v1439_v3 = vld [vmem:[#allocation8 + $0x270] sm:$0xff] }
 0x37e   : > { %2978 = vmatprep.subr.bf16.mxu0 %v3357_v37  ;;  %v3012_v4 = vpack.c.bf16 %v1439_v3, %v1438_v2  ;;  %v1628_v2 = vld [vmem:[#allocation8 + $0x3a8] sm:$0xff]  ;;  %v1629_v3 = vld [vmem:[#allocation8 + $0x3b0] sm:$0xff] }
 0x381   : > { %2980 = vmatpush3.bf16.msra.mxu0 %v2979_v7  ;;  %v1441_v7 = vld [vmem:[#allocation8 + $0x280] sm:$0xff] }
 0x382   : > { %2981 = vmatprep.subr.bf16.mxu0 %v3357_v37  ;;  %v3015_v5 = vpack.c.bf16 %v1441_v7, %v1440_v6  ;;  %v1630_v6 = vld [vmem:[#allocation8 + $0x3b8] sm:$0xff]  ;;  %v1631_v7 = vrot.slane %v3844_v1, 6 }
 0x385   : > { %2983 = vmatpush3.bf16.msra.mxu0 %v2982_v11  ;;  %v3018_v11 = vpack.c.bf16 %v1443_v9, %v1442_v8  ;;  %v1721_v8 = vld [vmem:[%s3950_s7 + $0x78] sm:$0xff] }
 0x386   : > { %2984 = vmatprep.subr.bf16.mxu0 %v3357_v37 }
 0x389   : > { %2986 = vmatpush3.bf16.msra.mxu0 %v2985_v14  ;;  %v3021_v14 = vpack.c.bf16 %v1445_v13, %v1444_v12  ;;  %v1722_v13 = vld [vmem:[%s3951_s8] sm:$0x1] }
 0x38a   : > { %2539 = vmatprep.subr.mxu0 %v3356_v41 }
 0x38d   : > { %2540 = vmatpush3.msra.mxu0 %v1270_v23  ;;  %v1450_v23 = vld [vmem:[#allocation8 + $0x2c8] sm:$0xff] }
 0x38e   : > { %2542 = vmatmul.mubr.msk.f32.vlgmr.msra.gmra.mrb[0].mxu0 %vm1000_vm2, %v1271_v27  ;;  %2987 = vmatprep.subr.bf16.mxu0 %v3357_v37  ;;  %v1529_v27 = vld [vmem:[#allocation8 + $0x2e8] sm:$0xff] }
 0x38f   : > { %2989 = vmatpush3.bf16.msra.mxu0 %v2988_v26  ;;  %2574 = vmatprep.mubr.msk.f32.mxu0 %vm3358_vm0, %v3356_v41  ;;  %v1528_v26 = vld [vmem:[#allocation8 + $0x2e0] sm:$0xff] }
 0x390   : > { %2990 = vmatprep.subr.bf16.mxu0 %v3357_v37  ;;  %v3033_v28 = vpack.c.bf16 %v1529_v27, %v1528_v26 }
 0x393   : > { %2992 = vmatpush3.bf16.msra.mxu0 %v2991_v33  ;;  %v1533_v33 = vld [vmem:[#allocation8 + $0x308] sm:$0xff] }
 0x394   : > { %2993 = vmatprep.subr.bf16.mxu0 %v3357_v37  ;;  %v3039_v10 = vpack.c.bf16 %v1533_v33, %v1532_v32 }
 0x397   : > { %2995 = vmatpush3.bf16.msra.mxu0 %v2994_v39  ;;  %v1537_v39 = vld [vmem:[#allocation8 + $0x328] sm:$0xff] }
 0x398   : > { %2996 = vmatprep.subr.bf16.mxu0 %v3357_v37  ;;  %v3045_v40 = vpack.c.bf16 %v1537_v39, %v1536_v38 }
 0x39b   : > { %2998 = vmatpush3.bf16.msra.mxu0 %v2997_v46  ;;  %v1617_v46 = vld [vmem:[#allocation8 + $0x350] sm:$0xff] }
 0x39c   : > { %2999 = vmatprep.subr.bf16.mxu0 %v3357_v37  ;;  %v3051_v48 = vpack.c.bf16 %v1617_v46, %v1616_v45 }
 0x39f   : > { %3001 = vmatpush3.bf16.msra.mxu0 %v3000_v52  ;;  %v3054_v52 = vpack.c.bf16 %v1619_v51, %v1618_v50 }
 0x3a0   : > { %3002 = vmatprep.subr.bf16.mxu0 %v3357_v37 }
 0x3a3   : > { %3004 = vmatpush3.bf16.msra.mxu0 %v3003_v56  ;;  %v1622_v56 = vld [vmem:[#allocation8 + $0x378] sm:$0xff] }
 0x3a4   : > { %3005 = vmatprep.subr.bf16.mxu0 %v3357_v37  ;;  %v3060_v58 = vpack.c.bf16 %v1623_v57, %v1622_v56 }
 0x3a7   : > { %3007 = vmatpush3.bf16.msra.mxu0 %v3006_v59  ;;  %v1624_v59 = vld [vmem:[#allocation8 + $0x388] sm:$0xff] }
 0x3a8   : > { %2572 = vmatprep.subr.mxu0 %v3356_v41  ;;  %v3063_v61 = vpack.c.bf16 %v1625_v60, %v1624_v59 }
 0x3ab   : > { %2573 = vmatpush3.msra.mxu0 %v1360_v63  ;;  %v1627_v63 = vld [vmem:[#allocation8 + $0x3a0] sm:$0xff] }
 0x3ac   : > { %2575 = vmatmul.mubr.msk.f32.vlgmr.msra.gmra.mrb[0].mxu0 %vm1000_vm2, %v3844_v1  ;;  %3008 = vmatprep.subr.bf16.mxu0 %v3357_v37 }
 0x3ad   : > { %3010 = vmatpush3.bf16.msra.mxu0 %v3009_v0  ;;  %2607 = vmatprep.mubr.msk.f32.mxu0 %vm3358_vm0, %v3356_v41  ;;  %v3066_v0 = vpack.c.bf16 %v1627_v63, %v1626_v62 }
 0x3ae   : > { %3011 = vmatprep.subr.bf16.mxu0 %v3357_v37 }
 0x3b1   : > { %3013 = vmatpush3.bf16.msra.mxu0 %v3012_v4  ;;  %v3069_v4 = vpack.c.bf16 %v1629_v3, %v1628_v2 }
 0x3b2   : > { %3014 = vmatprep.subr.bf16.mxu0 %v3357_v37 }
 0x3b5   : > { %3016 = vmatpush3.bf16.msra.mxu0 %v3015_v5  ;;  %v1720_v5 = vld [vmem:[%s3950_s7 + $0x70] sm:$0xff] }
 0x3b6   : > { %3017 = vmatprep.subr.bf16.mxu0 %v3357_v37 }
 0x3b9   : > { %3019 = vmatpush3.bf16.msra.mxu0 %v3018_v11 }
 0x3ba   : > { %3020 = vmatprep.subr.bf16.mxu0 %v3357_v37 }
 0x3bd   : > { %3022 = vmatpush3.bf16.msra.mxu0 %v3021_v14 }
 0x3be   : > { %3023 = vmatprep.subr.bf16.mxu0 %v3357_v37 }
 0x3c1   : > { %3025 = vmatpush3.bf16.msra.mxu0 %v3024_v17 }
 0x3c2   : > { %3026 = vmatprep.subr.bf16.mxu0 %v3357_v37 }
 0x3c5   : > { %3028 = vmatpush3.bf16.msra.mxu0 %v3027_v20 }
 0x3c6   : > { %2605 = vmatprep.subr.mxu0 %v3356_v41 }
 0x3c9   : > { %2606 = vmatpush3.msra.mxu0 %v1450_v23 }
 0x3ca   : > { %2608 = vmatmul.mubr.msk.f32.vlgmr.msra.gmra.mrb[0].mxu0 %vm1000_vm2, %v1451_v25  ;;  %3029 = vmatprep.subr.bf16.mxu0 %v3357_v37 }
 0x3cb   : > { %3031 = vmatpush3.bf16.msra.mxu0 %v3030_v24  ;;  %2640 = vmatprep.mubr.msk.f32.mxu0 %vm3358_vm0, %v3356_v41 }
 0x3cc   : > { %3032 = vmatprep.subr.bf16.mxu0 %v3357_v37 }
 0x3cf   : > { %3034 = vmatpush3.bf16.msra.mxu0 %v3033_v28 }
 0x3d0   : > { %3035 = vmatprep.subr.bf16.mxu0 %v3357_v37 }
 0x3d3   : > { %3037 = vmatpush3.bf16.msra.mxu0 %v3036_v31 }
 0x3d4   : > { %3038 = vmatprep.subr.bf16.mxu0 %v3357_v37 }
 0x3d7   : > { %3040 = vmatpush3.bf16.msra.mxu0 %v3039_v10 }
 0x3d8   : > { %3041 = vmatprep.subr.bf16.mxu0 %v3357_v37 }
 0x3db   : > { %3043 = vmatpush3.bf16.msra.mxu0 %v3042_v36 }
 0x3dc   : > { %3044 = vmatprep.subr.bf16.mxu0 %v3357_v37 }
 0x3df   : > { %3046 = vmatpush3.bf16.msra.mxu0 %v3045_v40 }
 0x3e0   : > { %3047 = vmatprep.subr.bf16.mxu0 %v3357_v37 }
 0x3e3   : > { %3049 = vmatpush3.bf16.msra.mxu0 %v3048_v44 }
 0x3e4   : > { %2638 = vmatprep.subr.mxu0 %v3356_v41 }
 0x3e7   : > { %2639 = vmatpush3.msra.mxu0 %v1540_v47 }
 0x3e8   : > { %2641 = vmatmul.mubr.msk.f32.vlgmr.msra.gmra.mrb[0].mxu0 %vm1000_vm2, %v1541_v49  ;;  %3050 = vmatprep.subr.bf16.mxu0 %v3357_v37 }
 0x3e9   : > { %3052 = vmatpush3.bf16.msra.mxu0 %v3051_v48  ;;  %2673 = vmatprep.mubr.msk.f32.mxu0 %vm3358_vm0, %v3356_v41 }
 0x3ea   : > { %3053 = vmatprep.subr.bf16.mxu0 %v3357_v37 }
 0x3ed   : > { %3055 = vmatpush3.bf16.msra.mxu0 %v3054_v52 }
 0x3ee   : > { %3056 = vmatprep.subr.bf16.mxu0 %v3357_v37 }
 0x3f1   : > { %3058 = vmatpush3.bf16.msra.mxu0 %v3057_v55 }
 0x3f2   : > { %3059 = vmatprep.subr.bf16.mxu0 %v3357_v37 }
 0x3f5   : > { %3061 = vmatpush3.bf16.msra.mxu0 %v3060_v58 }
 0x3f6   : > { %3062 = vmatprep.subr.bf16.mxu0 %v3357_v37 }
 0x3f9   : > { %3064 = vmatpush3.bf16.msra.mxu0 %v3063_v61 }
 0x3fa   : > { %3065 = vmatprep.subr.bf16.mxu0 %v3357_v37 }
 0x3fd   : > { %3067 = vmatpush3.bf16.msra.mxu0 %v3066_v0 }
 0x3fe   : > { %3068 = vmatprep.subr.bf16.mxu0 %v3357_v37  ;;  %v3093_v37 = vpack.c.bf16 %v1721_v8, %v1720_v5 }
 0x400   : > { %3094 = vmatpush3.bf16.msra.mxu1 %v3093_v37 }
 0x401   : > { %3070 = vmatpush3.bf16.msra.mxu0 %v3069_v4 }
 0x402   : > { %2671 = vmatprep.subr.mxu0 %v3356_v41  ;;  %v984_v41 = vld [vmem:[%s3949_s6] sm:$0x1] }
 0x405   : > { %2672 = vmatpush3.msra.mxu0 %v1630_v6 }
 0x406   : > { %2674 = vmatmul.mubr.msk.f32.vlgmr.msra.gmra.mrb[0].mxu0 %vm1000_vm2, %v1631_v7 }
 0x4d9   : > { %v1700_v9 = vpop.f32.mrb[0].mxu0 }
 0x4da   : > { %v3095_v11 = vadd.f32 %v1700_v9, %v984_v41  ;;  %v2675_v1 = vpop.f32.mrb[1].mxu0 }
 0x4dc   : > { %v1705_v12 = vmax.f32 %v3095_v11, 0.0 }
 0x4de   : > { %2709 = vmatmul.mubr.f32.vlgmr.msra.gmra.mrb[4].mxu1 %v1705_v12 }
 0x5b1   : > { %v1789_v14 = vpop.f32.mrb[4].mxu1 }
 0x5b2   : > { %v1790_v15 = vadd.f32 %v1789_v14, %v1722_v13  ;;  %v2710_v16 = vpop.f32.mrb[5].mxu1 }
 0x5b4   : > { %1793 = vst [vmem:[%s366_s25] sm:$0x1] %v1790_v15 }
 0x5b5   : > { %3292 = shalt.err (!%p3289_p9)
}
 0x5b6   : > { %s3293_s14 = scalar_lea.hbm %s3901_s11, 16  ;;  %s3297_s16 = scalar_lea.hbm %s3952_s9, 32 }
 0x5b7   : > { %p3294_p2 = scmp.ne.s32.totalorder %s3901_s11, %s3293_s14  ;;  %p3298_p5 = scmp.lt.u32.totalorder %s3901_s11, %s3952_s9 }
 0x5b8   : > { %p3299_p10 = scmp.lt.u32.totalorder %s3297_s16, %s3293_s14  ;;  %p3301_p12 = scmp.lt.u32.totalorder %s3293_s14, %s3901_s11 }
 0x5b9   : > { %p3295_p0 = pnand %p3294_p2, %p3976_p7 }
 0x5ba   : > { %p3300_p4 = por %p3299_p10, %p3298_p5 }
 0x5bb   : > { %p3296_p3 = pneg %p3295_p0 }
 0x5bc   : > { %p3302_p8 = por %p3301_p12, %p3300_p4 }
 0x5be   : > { %p3303_p11 = pnand %p3302_p8, %p3296_p3 }
 0x5c0   : > { %3306 = shalt.err (!%p3303_p11)
}
 0x5c1   : > { %3131 = dma.vmem_to_hbm [thread:$0]  (%p3976_p7), %s3903_s27, 16, %s3901_s11, %s1795_s26  }
 0x5c2 PF: > { %s3977_s17 = sld [smem:[#allocation13_spill]]  ;;  %s3978_s22 = sld [smem:[#allocation17_spill]] }
 0x5c3   : > { %p3153_p13 = scmp.ge.s32.totalorder %s3349_s12, 2 }
 0x5c8   : > { %s1819_s25 = sand.u32 1, %s3977_s17   ;;  %p3979_p1 = scmp.ne.s32.totalorder %s3978_s22, 0 }
 0x5c9   : > { %s1820_s29 = scalar_lea.sflag [#allocation5], %s1819_s25 }
 0x5ca   : > { %p3144_p6 = pnand %p3153_p13, %p3979_p1 }
 0x5cc   : > { %3332 = dma.done.wait (!%p3144_p6), %s1820_s29, 16  }
 0x5cd   : > { %3334 = vsyncadd (!%p3144_p6), %s1820_s29, 4294967280  ;;  %s3980_s12 = sld [smem:[#allocation15_spill]]  ;;  %s3981_s23 = sld [smem:[#allocation14_spill]] }
 0x5ce   : > { %s3982_s11 = sld [smem:[#allocation16_spill]]  ;;  %s3983_s30 = smov %s3341_s10 }
 0x5d3   : > { %p21_p9 = scmp.ge.s32.totalorder %s3980_s12, 4   ;;  %s3984_s10 = smov %s3981_s23 }
 0x5d5   :  { %23 = sbr.rel (!%p21_p9) target bundleno = 5 (0x5), region = 115 }
 0x5dc   :  { %1824 = vsyncpa [#allocation4], 1 }
 0x5dd   :  { %1826 = vsyncpa [#allocation4 + $0x1], 1 }
 0x5de   :  { %1827 = vsyncpa [#allocation7], 1 }
 0x5df   :  { %1828 = vsyncpa [#allocation5], 1 }
 0x5e0   :  { %1830 = vsyncpa [#allocation5 + $0x1], 1 }

</bundles_post_ra>
